<compile_context>
chip_gen: v7x
topology: tpu7x:2x2x1
jax: 0.10.0
libtpu: 0.0.40
codegen_flags: <defaults>
</compile_context>

<pallas_src>
import math

import jax
import jax.numpy as jnp
from jax.experimental import pallas as pl
from jax.experimental.pallas import tpu as pltpu

_INV_LN10 = 1.0 / math.log(10.0)
_PACK = 128  # lane-dense packed-output width


def _resident(arr):
    """Full-array BlockSpec with a constant block index (DMA'd once)."""
    nd = arr.ndim
    return pl.BlockSpec(arr.shape, lambda b, _nd=nd: (0,) * _nd)


# ---------------------------------------------------------------------------
# The fused per-batch forward kernel (grid = (B,)).
# ---------------------------------------------------------------------------
def _make_kernel(C, M_HR, M_RR, concat_dim, pack):
    C2 = 2 * C

    def kernel(x_ref, w_ref, b_ref, cos_ref, sin_ref, xf_ref, pool_ref,
               feat_ref, a_s_ref, a_t_ref, w1_ref, b1_ref, w2_ref, b2_ref,
               w3_ref, b3_ref, w45_ref, b45_ref, deep_ref, packed_ref):
        T = x_ref.shape[-1]
        Mpad = xf_ref.shape[-1]
        scale = 2.0 / T

        # 1) Feature extraction (1x1-conv stand-in) for BOTH branches:
        #    one (2*C2, cin) @ (cin, T) MXU push per batch element.
        x = x_ref[0]                                            # (cin, T)
        sig = (jnp.dot(w_ref[...], x, preferred_element_type=jnp.float32)
               + b_ref[...])                                    # (2*C2, T)
        deep_ref[0] = sig

        # 2) Masked-bin DFT of every channel, both branches batched over the
        #    group axis (group 0 = HR, group 1 = RR with zero-padded bins).
        sig3 = sig.reshape(2, C2, T)
        re = jnp.einsum('gct,gtm->gcm', sig3, cos_ref[...],
                        preferred_element_type=jnp.float32)     # (2, C2, Mpad)
        im = jnp.einsum('gct,gtm->gcm', sig3, sin_ref[...],
                        preferred_element_type=jnp.float32)
        power = scale * (re * re + im * im)                     # features_fft

        xf = xf_ref[...]                                        # (2, Mpad)
        pool = pool_ref[...]                                    # (Mpad, Mpad)
        gidx = jax.lax.broadcasted_iota(jnp.int32, (2, 1), 0)
        inv_cnt = jnp.where(gidx == 0, 1.0 / M_HR, 1.0 / M_RR)  # (2, 1)

        # SNR channel attention: AvgPool(2,1,'same') -> max/sum -> log10 ->
        # softmax over channels.  Pooling == matmul with a constant banded
        # matrix (runs on the MXU, off the VPU critical path).
        spec = jnp.dot(power.reshape(2 * C2, Mpad), pool,
                       preferred_element_type=jnp.float32).reshape(2, C2, Mpad)
        snr = (jnp.max(spec, axis=-1, keepdims=True) /
               jnp.sum(spec, axis=-1, keepdims=True))           # (2, C2, 1)
        snr = jnp.log(snr) * _INV_LN10
        snr = snr - jnp.max(snr, axis=1, keepdims=True)
        e = jnp.exp(snr)
        ch_att = e / jnp.sum(e, axis=1, keepdims=True)          # (2, C2, 1)

        # Channel-fused spectrum and spectral hard attention.  The reference
        # normalizes the pooled spectrum before thresholding against its
        # mean; `x/s > mean(x/s)` is scale-invariant, so compare vs sum/M.
        fused = jnp.sum(ch_att * power, axis=1)                 # (2, Mpad)
        att = jnp.dot(fused, pool, preferred_element_type=jnp.float32)
        spec_att = jnp.where(
            att > jnp.sum(att, axis=-1, keepdims=True) * inv_cnt, 1.0, 0.0)

        # DominantFreqRegression per modality: normalize each channel by its
        # full masked-bin sum, apply spectral attention, xf-weighted sum,
        # mean over channels (commutes with the shared attention/xf weights).
        pn = power / jnp.sum(power, axis=-1, keepdims=True)     # (2, C2, Mpad)
        sxf = spec_att * xf                                     # (2, Mpad)
        out_a = jnp.sum(jnp.mean(pn[:, :C, :], axis=1) * sxf,
                        axis=-1, keepdims=True)                 # (2, 1)
        out_b = jnp.sum(jnp.mean(pn[:, C:, :], axis=1) * sxf,
                        axis=-1, keepdims=True)

        # Merged regression (channel-attention-fused time signal, no spectral
        # attention): FFT is linear, so recombine the existing re/im.
        re_f = jnp.sum(ch_att * re, axis=1)                     # (2, Mpad)
        im_f = jnp.sum(ch_att * im, axis=1)
        pf = re_f * re_f + im_f * im_f                          # 2/T cancels
        pf = pf / jnp.sum(pf, axis=-1, keepdims=True)
        out_m = jnp.sum(pf * xf, axis=-1, keepdims=True)        # (2, 1)

        # Spectral-attention-weighted mean spectrum per channel -> MLP feats.
        feat = jnp.sum(spec_att[:, None, :] * power, axis=-1) * inv_cnt  # (2, C2)

        # 3) concat_feature = [feat_HR | merged_HR | feat_RR | merged_RR |
        #                      feature[:, :3]]
        feat3 = feat_ref[0, :, 0:3]                             # (1, 3)
        concat = jnp.concatenate(
            [feat[0:1], out_m[0:1], feat[1:2], out_m[1:2], feat3], axis=-1)

        # 4) VO2 regressor: eval-BN folded, hidden padded to 128, w5 folded
        #    into w4 (no ReLU between them) -> 4 MXU pushes.
        h = jnp.maximum(concat * a_s_ref[...] + a_t_ref[...], 0.0)
        h = jnp.maximum(
            jnp.dot(h, w1_ref[...], preferred_element_type=jnp.float32)
            + b1_ref[...], 0.0)
        h = jnp.maximum(
            jnp.dot(h, w2_ref[...], preferred_element_type=jnp.float32)
            + b2_ref[...], 0.0)
        h = jnp.maximum(
            jnp.dot(h, w3_ref[...], preferred_element_type=jnp.float32)
            + b3_ref[...], 0.0)
        vo2 = (jnp.dot(h, w45_ref[...], preferred_element_type=jnp.float32)
               + b45_ref[...])                                  # (1, 1)

        # 5) Lane-dense packed row: static slice stores.
        #    [6 aux regressions | VO2 | concat_feature | zeros]
        packed_ref[0, :, 0:1] = out_a[0:1]   # ECG-HR_patch
        packed_ref[0, :, 1:2] = out_b[0:1]   # SCG-HR_patch
        packed_ref[0, :, 2:3] = out_m[0:1]   # merged-HR_patch
        packed_ref[0, :, 3:4] = out_a[1:2]   # SCG-RR_cosmed
        packed_ref[0, :, 4:5] = out_b[1:2]   # PPG-RR_cosmed
        packed_ref[0, :, 5:6] = out_m[1:2]   # merged-RR_cosmed
        packed_ref[0, :, 6:7] = vo2          # VO2_cosmed
        packed_ref[0, :, 7:7 + concat_dim] = concat
        packed_ref[0, :, 7 + concat_dim:] = jnp.zeros(
            (1, pack - 7 - concat_dim), jnp.float32)

    return kernel


# ---------------------------------------------------------------------------
# Wrapper: one pallas_call gridded over batch, lane-dense outputs unpacked.
# ---------------------------------------------------------------------------
def cardioresp_multiverse_forward(params, ecg, scg, ppg, feature):
    B, _, T = ecg.shape
    C = params["channel_n"]
    C2 = 2 * C
    concat_dim = 4 * C + 5
    assert 7 + concat_dim <= _PACK

    x = jnp.concatenate([ecg, scg, ppg], axis=1)            # (B, cin, T)
    cin = x.shape[1]
    feat3d = feature.reshape(B, 1, feature.shape[1])         # (B, 1, F)

    mlp = params["mlp"]
    consts = (params["w_all"], params["b_all"], params["cos"], params["sin"],
              params["xf"], params["pool"])
    mlp_args = (mlp["a_scale"], mlp["a_shift"], mlp["w1"], mlp["b1"],
                mlp["w2"], mlp["b2"], mlp["w3"], mlp["b3"],
                mlp["w45"], mlp["b45"])

    kernel = _make_kernel(C, params["M_HR"], params["M_RR"], concat_dim, _PACK)

    deep, packed = pl.pallas_call(
        kernel,
        grid=(B,),
        out_shape=(
            jax.ShapeDtypeStruct((B, 2 * C2, T), jnp.float32),
            jax.ShapeDtypeStruct((B, 1, _PACK), jnp.float32),
        ),
        in_specs=(
            [pl.BlockSpec((1, cin, T), lambda b: (b, 0, 0))]
            + [_resident(a) for a in consts]
            + [pl.BlockSpec((1, 1, feat3d.shape[-1]), lambda b: (b, 0, 0))]
            + [_resident(a) for a in mlp_args]),
        out_specs=(
            pl.BlockSpec((1, 2 * C2, T), lambda b: (b, 0, 0)),
            pl.BlockSpec((1, 1, _PACK), lambda b: (b, 0, 0)),
        ),
        compiler_params=pltpu.CompilerParams(
            dimension_semantics=("parallel",)),
    )(x, *consts, feat3d, *mlp_args)

    deep_feature = {
        "ECG-HR_patch": deep[:, 0:C],
        "SCG-HR_patch": deep[:, C:C2],
        "SCG-RR_cosmed": deep[:, C2:C2 + C],
        "PPG-RR_cosmed": deep[:, C2 + C:],
    }
    small = packed[:, 0, :]
    output = {
        "ECG-HR_patch": small[:, 0:1],
        "SCG-HR_patch": small[:, 1:2],
        "merged-HR_patch": small[:, 2:3],
        "SCG-RR_cosmed": small[:, 3:4],
        "PPG-RR_cosmed": small[:, 4:5],
        "merged-RR_cosmed": small[:, 5:6],
        "VO2_cosmed": small[:, 6:7],
    }
    concat_feature = small[:, 7:7 + concat_dim]
    # NOTE: features_fft_HR_SCG / features_fft_RR_SCG in the reference are
    #       computed but never used (dead compute) -> omitted.
    return output, deep_feature, concat_feature


# ---------------------------------------------------------------------------
# Deterministic synthetic parameters.
# ---------------------------------------------------------------------------
def _make_dft(T, fs, lo, hi, m_pad):
    m = hi - lo
    bins = jnp.arange(lo, hi, dtype=jnp.float32)
    t = jnp.arange(T, dtype=jnp.float32)
    ang = 2.0 * math.pi * t[:, None] * bins[None, :] / T
    cos = jnp.zeros((T, m_pad), jnp.float32).at[:, :m].set(jnp.cos(ang))
    sin = jnp.zeros((T, m_pad), jnp.float32).at[:, :m].set(jnp.sin(ang))
    xf = jnp.zeros((m_pad,), jnp.float32).at[:m].set(bins * (fs / T))
    return cos, sin, xf


def init_params(key, channel_n=4, T=128, fs=32.0,
                hr_bins=(8, 40), rr_bins=(2, 18)):
    C = channel_n
    C2 = 2 * C
    M_HR = hr_bins[1] - hr_bins[0]
    M_RR = rr_bins[1] - rr_bins[0]
    Mpad = max(M_HR, M_RR)
    keys = jax.random.split(key, 10)

    # Feature-extractor stand-ins: 1x1 Conv1d projections.
    def conv_w(k, c_in):
        kw, kb = jax.random.split(k)
        lim = 1.0 / math.sqrt(c_in)
        return (jax.random.uniform(kw, (C, c_in), jnp.float32, -lim, lim),
                jax.random.uniform(kb, (C,), jnp.float32, -lim, lim))

    w_ecg, b_ecg = conv_w(keys[0], 1)      # ECG-HR_patch
    w_scgh, b_scgh = conv_w(keys[1], 3)    # SCG-HR_patch
    w_scgr, b_scgr = conv_w(keys[2], 3)    # SCG-RR_cosmed
    w_ppg, b_ppg = conv_w(keys[3], 2)      # PPG-RR_cosmed

    cin = 6                                # stacked raw channels [ecg|scg|ppg]
    w_all = jnp.zeros((2 * C2, cin), jnp.float32)
    w_all = (w_all.at[:C, 0:1].set(w_ecg)
                  .at[C:C2, 1:4].set(w_scgh)
                  .at[C2:C2 + C, 1:4].set(w_scgr)
                  .at[C2 + C:, 4:6].set(w_ppg))
    b_all = jnp.concatenate([b_ecg, b_scgh, b_scgr, b_ppg])[:, None]

    # Per-group masked-bin DFT matrices (RR padded to Mpad bins) + xf grid.
    cos_h, sin_h, xf_h = _make_dft(T, fs, hr_bins[0], hr_bins[1], Mpad)
    cos_r, sin_r, xf_r = _make_dft(T, fs, rr_bins[0], rr_bins[1], Mpad)
    cos3 = jnp.stack([cos_h, cos_r], axis=0)       # (2, T, Mpad)
    sin3 = jnp.stack([sin_h, sin_r], axis=0)
    xf = jnp.stack([xf_h, xf_r], axis=0)           # (2, Mpad)

    # AvgPool(k=2, s=1, same, right zero-pad) as a constant banded matrix.
    pool = 0.5 * (jnp.eye(Mpad, dtype=jnp.float32)
                  + jnp.eye(Mpad, k=-1, dtype=jnp.float32))

    # VO2 regressor: 4 x [BN(eval) -> ReLU -> Linear] + Linear.  BN_{i+1} is
    # folded into Linear_i, Linear5 folded into Linear4 (no ReLU between),
    # hidden 100 zero-padded to 128 (exact equivalence).
    concat_dim = 4 * C + 5
    hidden, HP = 100, 128
    eps = 1e-5
    dims_in = [concat_dim, hidden, hidden, hidden]
    scales = [jnp.full((d,), 1.0 / math.sqrt(1.0 + eps), jnp.float32)
              for d in dims_in]
    shifts = [jnp.zeros((d,), jnp.float32) for d in dims_in]

    def lin(k, din, dout):
        kw, kb = jax.random.split(k)
        lim = 1.0 / math.sqrt(din)
        return (jax.random.uniform(kw, (din, dout), jnp.float32, -lim, lim),
                jax.random.uniform(kb, (dout,), jnp.float32, -lim, lim))

    W1, b1 = lin(keys[4], concat_dim, hidden)
    W2, b2 = lin(keys[5], hidden, hidden)
    W3, b3 = lin(keys[6], hidden, hidden)
    W4, b4 = lin(keys[7], hidden, hidden)
    W5, b5 = lin(keys[8], hidden, 1)

    W1f = W1 * scales[1][None, :]; b1f = b1 * scales[1] + shifts[1]
    W2f = W2 * scales[2][None, :]; b2f = b2 * scales[2] + shifts[2]
    W3f = W3 * scales[3][None, :]; b3f = b3 * scales[3] + shifts[3]
    W45 = W4 @ W5
    b45 = b4 @ W5 + b5

    def pad_w(w, r, c):
        return jnp.zeros((r, c), jnp.float32).at[:w.shape[0], :w.shape[1]].set(w)

    def pad_b(b, c):
        return jnp.zeros((1, c), jnp.float32).at[0, :b.shape[0]].set(b)

    mlp = dict(
        a_scale=scales[0][None, :], a_shift=shifts[0][None, :],
        w1=pad_w(W1f, concat_dim, HP), b1=pad_b(b1f, HP),
        w2=pad_w(W2f, HP, HP), b2=pad_b(b2f, HP),
        w3=pad_w(W3f, HP, HP), b3=pad_b(b3f, HP),
        w45=pad_w(W45, HP, 1), b45=b45[None, :],
    )
    return dict(channel_n=C, M_HR=M_HR, M_RR=M_RR,
                w_all=w_all, b_all=b_all, cos=cos3, sin=sin3,
                xf=xf, pool=pool, mlp=mlp)


if __name__ == "__main__":
    key = jax.random.PRNGKey(0)
    B, T, channel_n = 2, 128, 4
    k1, k2, k3, k4, kp = jax.random.split(key, 5)
    ecg = jax.random.normal(k1, (B, 1, T), jnp.float32)
    scg = jax.random.normal(k2, (B, 3, T), jnp.float32)
    ppg = jax.random.normal(k3, (B, 2, T), jnp.float32)
    feature = jax.random.normal(k4, (B, 5), jnp.float32)

    params = init_params(kp, channel_n=channel_n, T=T)

    fwd = jax.jit(
        lambda e, s, p, f: cardioresp_multiverse_forward(params, e, s, p, f))
    output, deep, concat_feature = fwd(ecg, scg, ppg, feature)
    jax.block_until_ready((output, deep, concat_feature))

    assert output["VO2_cosmed"].shape == (B, 1)
    assert output["merged-HR_patch"].shape == (B, 1)
    assert output["ECG-HR_patch"].shape == (B, 1)
    assert concat_feature.shape == (B, channel_n * 2 * 2 + 2 + 3)
    assert deep["ECG-HR_patch"].shape == (B, channel_n, T)
    assert deep["PPG-RR_cosmed"].shape == (B, channel_n, T)
    assert bool(jnp.all(jnp.isfinite(output["VO2_cosmed"])))
    assert bool(jnp.all(jnp.isfinite(concat_feature)))
    print("KERNEL_OK")
</pallas_src>

<mosaic_0001>
module attributes {stable_mosaic.version = 11 : i64} {
  func.func @kernel(%arg0: i32, %arg1: memref<1x6x128xf32, #tpu.memory_space<vmem>>, %arg2: memref<16x6xf32, #tpu.memory_space<vmem>>, %arg3: memref<16x1xf32, #tpu.memory_space<vmem>>, %arg4: memref<2x128x32xf32, #tpu.memory_space<vmem>>, %arg5: memref<2x128x32xf32, #tpu.memory_space<vmem>>, %arg6: memref<2x32xf32, #tpu.memory_space<vmem>>, %arg7: memref<32x32xf32, #tpu.memory_space<vmem>>, %arg8: memref<1x1x5xf32, #tpu.memory_space<vmem>>, %arg9: memref<1x21xf32, #tpu.memory_space<vmem>>, %arg10: memref<1x21xf32, #tpu.memory_space<vmem>>, %arg11: memref<21x128xf32, #tpu.memory_space<vmem>>, %arg12: memref<1x128xf32, #tpu.memory_space<vmem>>, %arg13: memref<128x128xf32, #tpu.memory_space<vmem>>, %arg14: memref<1x128xf32, #tpu.memory_space<vmem>>, %arg15: memref<128x128xf32, #tpu.memory_space<vmem>>, %arg16: memref<1x128xf32, #tpu.memory_space<vmem>>, %arg17: memref<128x1xf32, #tpu.memory_space<vmem>>, %arg18: memref<1x1xf32, #tpu.memory_space<vmem>>, %arg19: memref<1x16x128xf32, #tpu.memory_space<vmem>>, %arg20: memref<1x1x128xf32, #tpu.memory_space<vmem>>) attributes {dimension_semantics = [#tpu.dimension_semantics<parallel>], iteration_bounds = array<i64: 2>, scalar_prefetch = 0 : i64, scratch_operands = 0 : i64, tpu.core_type = #tpu.core_type<tc>, window_params = [{transform_indices = @transform_0, window_bounds = array<i64: 1, 6, 128>}, {pipeline_mode = #tpu.pipeline_mode<synchronous>, transform_indices = @transform_1, window_bounds = array<i64: 16, 6>}, {pipeline_mode = #tpu.pipeline_mode<synchronous>, transform_indices = @transform_2, window_bounds = array<i64: 16, 1>}, {pipeline_mode = #tpu.pipeline_mode<synchronous>, transform_indices = @transform_3, window_bounds = array<i64: 2, 128, 32>}, {pipeline_mode = #tpu.pipeline_mode<synchronous>, transform_indices = @transform_4, window_bounds = array<i64: 2, 128, 32>}, {pipeline_mode = #tpu.pipeline_mode<synchronous>, transform_indices = @transform_5, window_bounds = array<i64: 2, 32>}, {pipeline_mode = #tpu.pipeline_mode<synchronous>, transform_indices = @transform_6, window_bounds = array<i64: 32, 32>}, {transform_indices = @transform_7, window_bounds = array<i64: 1, 1, 5>}, {pipeline_mode = #tpu.pipeline_mode<synchronous>, transform_indices = @transform_8, window_bounds = array<i64: 1, 21>}, {pipeline_mode = #tpu.pipeline_mode<synchronous>, transform_indices = @transform_9, window_bounds = array<i64: 1, 21>}, {pipeline_mode = #tpu.pipeline_mode<synchronous>, transform_indices = @transform_10, window_bounds = array<i64: 21, 128>}, {pipeline_mode = #tpu.pipeline_mode<synchronous>, transform_indices = @transform_11, window_bounds = array<i64: 1, 128>}, {pipeline_mode = #tpu.pipeline_mode<synchronous>, transform_indices = @transform_12, window_bounds = array<i64: 128, 128>}, {pipeline_mode = #tpu.pipeline_mode<synchronous>, transform_indices = @transform_13, window_bounds = array<i64: 1, 128>}, {pipeline_mode = #tpu.pipeline_mode<synchronous>, transform_indices = @transform_14, window_bounds = array<i64: 128, 128>}, {pipeline_mode = #tpu.pipeline_mode<synchronous>, transform_indices = @transform_15, window_bounds = array<i64: 1, 128>}, {pipeline_mode = #tpu.pipeline_mode<synchronous>, transform_indices = @transform_16, window_bounds = array<i64: 128, 1>}, {pipeline_mode = #tpu.pipeline_mode<synchronous>, transform_indices = @transform_17, window_bounds = array<i64: 1, 1>}, {transform_indices = @transform_18, window_bounds = array<i64: 1, 16, 128>}, {transform_indices = @transform_19, window_bounds = array<i64: 1, 1, 128>}]} {
    %c0 = arith.constant 0 : index
    %c0_0 = arith.constant 0 : index
    %c0_1 = arith.constant 0 : index
    %0 = vector.load %arg1[%c0, %c0_0, %c0_1] : memref<1x6x128xf32, #tpu.memory_space<vmem>>, vector<1x6x128xf32>
    %1 = vector.shape_cast %0 : vector<1x6x128xf32> to vector<6x128xf32>
    %c0_2 = arith.constant 0 : index
    %c0_3 = arith.constant 0 : index
    %2 = vector.load %arg2[%c0_2, %c0_3] : memref<16x6xf32, #tpu.memory_space<vmem>>, vector<16x6xf32>
    %cst = arith.constant dense<0.000000e+00> : vector<16x128xf32>
    %3 = tpu.matmul %2, %1, %cst {dimension_numbers = #tpu.dot_dimension_numbers<[1], [0], [0], [1], [0, 0, 1, 1], [], []>} : vector<16x6xf32>, vector<6x128xf32>, vector<16x128xf32> -> vector<16x128xf32>
    %c0_4 = arith.constant 0 : index
    %c0_5 = arith.constant 0 : index
    %4 = vector.load %arg3[%c0_4, %c0_5] : memref<16x1xf32, #tpu.memory_space<vmem>>, vector<16x1xf32>
    %5 = vector.broadcast %4 : vector<16x1xf32> to vector<16x128xf32>
    %6 = arith.addf %3, %5 : vector<16x128xf32>
    %c0_6 = arith.constant 0 : index
    %c0_7 = arith.constant 0 : index
    %c0_8 = arith.constant 0 : index
    %7 = vector.load %arg19[%c0_6, %c0_7, %c0_8] : memref<1x16x128xf32, #tpu.memory_space<vmem>>, vector<1x16x128xf32>
    %8 = vector.shape_cast %7 : vector<1x16x128xf32> to vector<16x128xf32>
    %9 = vector.shape_cast %6 : vector<16x128xf32> to vector<1x16x128xf32>
    tpu.vector_store %arg19[%c0_6, %c0_7, %c0_8], %9 {strides = array<i32>} : memref<1x16x128xf32, #tpu.memory_space<vmem>>, vector<1x16x128xf32>,
    %10 = vector.shape_cast %6 : vector<16x128xf32> to vector<2x8x128xf32>
    %c0_9 = arith.constant 0 : index
    %c0_10 = arith.constant 0 : index
    %c0_11 = arith.constant 0 : index
    %11 = vector.load %arg4[%c0_9, %c0_10, %c0_11] : memref<2x128x32xf32, #tpu.memory_space<vmem>>, vector<2x128x32xf32>
    "tpu.trace_start"() <{level = 10 : i32, message = "gct,gtm->gcm"}> : () -> ()
    %cst_12 = arith.constant dense<0.000000e+00> : vector<2x8x32xf32>
    %12 = tpu.matmul %10, %11, %cst_12 {dimension_numbers = #tpu.dot_dimension_numbers<[2], [1], [1], [2], [0, 0, 0, 1, 1, 2], [0], [0]>} : vector<2x8x128xf32>, vector<2x128x32xf32>, vector<2x8x32xf32> -> vector<2x8x32xf32>
    "tpu.trace_stop"() : () -> ()
    %c0_13 = arith.constant 0 : index
    %c0_14 = arith.constant 0 : index
    %c0_15 = arith.constant 0 : index
    %13 = vector.load %arg5[%c0_13, %c0_14, %c0_15] : memref<2x128x32xf32, #tpu.memory_space<vmem>>, vector<2x128x32xf32>
    "tpu.trace_start"() <{level = 10 : i32, message = "gct,gtm->gcm"}> : () -> ()
    %cst_16 = arith.constant dense<0.000000e+00> : vector<2x8x32xf32>
    %14 = tpu.matmul %10, %13, %cst_16 {dimension_numbers = #tpu.dot_dimension_numbers<[2], [1], [1], [2], [0, 0, 0, 1, 1, 2], [0], [0]>} : vector<2x8x128xf32>, vector<2x128x32xf32>, vector<2x8x32xf32> -> vector<2x8x32xf32>
    "tpu.trace_stop"() : () -> ()
    %15 = arith.mulf %12, %12 : vector<2x8x32xf32>
    %16 = arith.mulf %14, %14 : vector<2x8x32xf32>
    %17 = arith.addf %15, %16 : vector<2x8x32xf32>
    %cst_17 = arith.constant 1.562500e-02 : f32
    %18 = vector.broadcast %cst_17 : f32 to vector<2x8x32xf32>
    %19 = arith.mulf %18, %17 : vector<2x8x32xf32>
    %c0_18 = arith.constant 0 : index
    %c0_19 = arith.constant 0 : index
    %20 = vector.load %arg6[%c0_18, %c0_19] : memref<2x32xf32, #tpu.memory_space<vmem>>, vector<2x32xf32>
    %c0_20 = arith.constant 0 : index
    %c0_21 = arith.constant 0 : index
    %21 = vector.load %arg7[%c0_20, %c0_21] : memref<32x32xf32, #tpu.memory_space<vmem>>, vector<32x32xf32>
    %22 = tpu.iota {dimensions = array<i32: 0>} : vector<2x1xi32>
    %c0_i32 = arith.constant 0 : i32
    %23 = vector.broadcast %c0_i32 : i32 to vector<2x1xi32>
    %24 = arith.cmpi eq, %22, %23 : vector<2x1xi32>
    %cst_22 = arith.constant 3.125000e-02 : f32
    %cst_23 = arith.constant 6.250000e-02 : f32
    %25 = vector.broadcast %cst_22 : f32 to vector<2x1xf32>
    %26 = vector.broadcast %cst_23 : f32 to vector<2x1xf32>
    %27 = arith.select %24, %25, %26 : vector<2x1xi1>, vector<2x1xf32>
    %28 = vector.shape_cast %19 : vector<2x8x32xf32> to vector<16x32xf32>
    %cst_24 = arith.constant dense<0.000000e+00> : vector<16x32xf32>
    %29 = tpu.matmul %28, %21, %cst_24 {dimension_numbers = #tpu.dot_dimension_numbers<[1], [0], [0], [1], [0, 0, 1, 1], [], []>} : vector<16x32xf32>, vector<32x32xf32>, vector<16x32xf32> -> vector<16x32xf32>
    %30 = vector.shape_cast %29 : vector<16x32xf32> to vector<2x8x32xf32>
    %cst_25 = arith.constant dense<0xFF800000> : vector<2x8xf32>
    %31 = vector.multi_reduction <maximumf>, %30, %cst_25 [2] : vector<2x8x32xf32> to vector<2x8xf32>
    %32 = vector.shape_cast %31 : vector<2x8xf32> to vector<2x8x1xf32>
    %cst_26 = arith.constant dense<0.000000e+00> : vector<2x8xf32>
    %33 = vector.multi_reduction <add>, %30, %cst_26 [2] : vector<2x8x32xf32> to vector<2x8xf32>
    %34 = vector.shape_cast %33 : vector<2x8xf32> to vector<2x8x1xf32>
    %35 = arith.divf %32, %34 : vector<2x8x1xf32>
    %36 = math.log %35 : vector<2x8x1xf32>
    %cst_27 = arith.constant 0.434294492 : f32
    %37 = vector.broadcast %cst_27 : f32 to vector<2x8x1xf32>
    %38 = arith.mulf %36, %37 : vector<2x8x1xf32>
    %cst_28 = arith.constant dense<0xFF800000> : vector<2x1xf32>
    %39 = vector.multi_reduction <maximumf>, %38, %cst_28 [1] : vector<2x8x1xf32> to vector<2x1xf32>
    %40 = vector.shape_cast %39 : vector<2x1xf32> to vector<2x1x1xf32>
    %41 = vector.broadcast %40 : vector<2x1x1xf32> to vector<2x8x1xf32>
    %42 = arith.subf %38, %41 : vector<2x8x1xf32>
    %43 = math.exp %42 : vector<2x8x1xf32>
    %cst_29 = arith.constant dense<0.000000e+00> : vector<2x1xf32>
    %44 = vector.multi_reduction <add>, %43, %cst_29 [1] : vector<2x8x1xf32> to vector<2x1xf32>
    %45 = vector.shape_cast %44 : vector<2x1xf32> to vector<2x1x1xf32>
    %46 = vector.broadcast %45 : vector<2x1x1xf32> to vector<2x8x1xf32>
    %47 = arith.divf %43, %46 : vector<2x8x1xf32>
    %48 = vector.broadcast %47 : vector<2x8x1xf32> to vector<2x8x32xf32>
    %49 = arith.mulf %48, %19 : vector<2x8x32xf32>
    %cst_30 = arith.constant dense<0.000000e+00> : vector<2x32xf32>
    %50 = vector.multi_reduction <add>, %49, %cst_30 [1] : vector<2x8x32xf32> to vector<2x32xf32>
    %cst_31 = arith.constant dense<0.000000e+00> : vector<2x32xf32>
    %51 = tpu.matmul %50, %21, %cst_31 {dimension_numbers = #tpu.dot_dimension_numbers<[1], [0], [0], [1], [0, 0, 1, 1], [], []>} : vector<2x32xf32>, vector<32x32xf32>, vector<2x32xf32> -> vector<2x32xf32>
    %cst_32 = arith.constant dense<0.000000e+00> : vector<2xf32>
    %52 = vector.multi_reduction <add>, %51, %cst_32 [1] : vector<2x32xf32> to vector<2xf32>
    %53 = vector.shape_cast %52 : vector<2xf32> to vector<2x1xf32>
    %54 = arith.mulf %53, %27 : vector<2x1xf32>
    %55 = vector.broadcast %54 : vector<2x1xf32> to vector<2x32xf32>
    %56 = arith.cmpf ogt, %51, %55 : vector<2x32xf32>
    %cst_33 = arith.constant 1.000000e+00 : f32
    %cst_34 = arith.constant 0.000000e+00 : f32
    %57 = vector.broadcast %cst_33 : f32 to vector<2x32xf32>
    %58 = vector.broadcast %cst_34 : f32 to vector<2x32xf32>
    %59 = arith.select %56, %57, %58 : vector<2x32xi1>, vector<2x32xf32>
    %cst_35 = arith.constant dense<0.000000e+00> : vector<2x8xf32>
    %60 = vector.multi_reduction <add>, %19, %cst_35 [2] : vector<2x8x32xf32> to vector<2x8xf32>
    %61 = vector.shape_cast %60 : vector<2x8xf32> to vector<2x8x1xf32>
    %62 = vector.broadcast %61 : vector<2x8x1xf32> to vector<2x8x32xf32>
    %63 = arith.divf %19, %62 : vector<2x8x32xf32>
    %64 = arith.mulf %59, %20 : vector<2x32xf32>
    %65 = vector.extract_strided_slice %63 {offsets = [0, 0, 0], sizes = [2, 4, 32], strides = [1, 1, 1]} : vector<2x8x32xf32> to vector<2x4x32xf32>
    %cst_36 = arith.constant dense<0.000000e+00> : vector<2x32xf32>
    %66 = vector.multi_reduction <add>, %65, %cst_36 [1] : vector<2x4x32xf32> to vector<2x32xf32>
    %cst_37 = arith.constant 4.000000e+00 : f32
    %67 = vector.broadcast %cst_37 : f32 to vector<2x32xf32>
    %68 = arith.divf %66, %67 : vector<2x32xf32>
    %69 = arith.mulf %68, %64 : vector<2x32xf32>
    %cst_38 = arith.constant dense<0.000000e+00> : vector<2xf32>
    %70 = vector.multi_reduction <add>, %69, %cst_38 [1] : vector<2x32xf32> to vector<2xf32>
    %71 = vector.shape_cast %70 : vector<2xf32> to vector<2x1xf32>
    %72 = vector.extract_strided_slice %63 {offsets = [0, 4, 0], sizes = [2, 4, 32], strides = [1, 1, 1]} : vector<2x8x32xf32> to vector<2x4x32xf32>
    %cst_39 = arith.constant dense<0.000000e+00> : vector<2x32xf32>
    %73 = vector.multi_reduction <add>, %72, %cst_39 [1] : vector<2x4x32xf32> to vector<2x32xf32>
    %cst_40 = arith.constant 4.000000e+00 : f32
    %74 = vector.broadcast %cst_40 : f32 to vector<2x32xf32>
    %75 = arith.divf %73, %74 : vector<2x32xf32>
    %76 = arith.mulf %75, %64 : vector<2x32xf32>
    %cst_41 = arith.constant dense<0.000000e+00> : vector<2xf32>
    %77 = vector.multi_reduction <add>, %76, %cst_41 [1] : vector<2x32xf32> to vector<2xf32>
    %78 = vector.shape_cast %77 : vector<2xf32> to vector<2x1xf32>
    %79 = vector.broadcast %47 : vector<2x8x1xf32> to vector<2x8x32xf32>
    %80 = arith.mulf %79, %12 : vector<2x8x32xf32>
    %cst_42 = arith.constant dense<0.000000e+00> : vector<2x32xf32>
    %81 = vector.multi_reduction <add>, %80, %cst_42 [1] : vector<2x8x32xf32> to vector<2x32xf32>
    %82 = vector.broadcast %47 : vector<2x8x1xf32> to vector<2x8x32xf32>
    %83 = arith.mulf %82, %14 : vector<2x8x32xf32>
    %cst_43 = arith.constant dense<0.000000e+00> : vector<2x32xf32>
    %84 = vector.multi_reduction <add>, %83, %cst_43 [1] : vector<2x8x32xf32> to vector<2x32xf32>
    %85 = arith.mulf %81, %81 : vector<2x32xf32>
    %86 = arith.mulf %84, %84 : vector<2x32xf32>
    %87 = arith.addf %85, %86 : vector<2x32xf32>
    %cst_44 = arith.constant dense<0.000000e+00> : vector<2xf32>
    %88 = vector.multi_reduction <add>, %87, %cst_44 [1] : vector<2x32xf32> to vector<2xf32>
    %89 = vector.shape_cast %88 : vector<2xf32> to vector<2x1xf32>
    %90 = vector.broadcast %89 : vector<2x1xf32> to vector<2x32xf32>
    %91 = arith.divf %87, %90 : vector<2x32xf32>
    %92 = arith.mulf %91, %20 : vector<2x32xf32>
    %cst_45 = arith.constant dense<0.000000e+00> : vector<2xf32>
    %93 = vector.multi_reduction <add>, %92, %cst_45 [1] : vector<2x32xf32> to vector<2xf32>
    %94 = vector.shape_cast %93 : vector<2xf32> to vector<2x1xf32>
    %95 = vector.shape_cast %59 : vector<2x32xf32> to vector<2x1x32xf32>
    %96 = vector.broadcast %95 : vector<2x1x32xf32> to vector<2x8x32xf32>
    %97 = arith.mulf %96, %19 : vector<2x8x32xf32>
    %cst_46 = arith.constant dense<0.000000e+00> : vector<2x8xf32>
    %98 = vector.multi_reduction <add>, %97, %cst_46 [2] : vector<2x8x32xf32> to vector<2x8xf32>
    %99 = vector.broadcast %27 : vector<2x1xf32> to vector<2x8xf32>
    %100 = arith.mulf %98, %99 : vector<2x8xf32>
    %c0_47 = arith.constant 0 : index
    %c0_48 = arith.constant 0 : index
    %c0_49 = arith.constant 0 : index
    %101 = vector.load %arg8[%c0_47, %c0_48, %c0_49] : memref<1x1x5xf32, #tpu.memory_space<vmem>>, vector<1x1x3xf32>
    %102 = vector.shape_cast %101 : vector<1x1x3xf32> to vector<1x3xf32>
    %103 = vector.extract_strided_slice %100 {offsets = [0, 0], sizes = [1, 8], strides = [1, 1]} : vector<2x8xf32> to vector<1x8xf32>
    %104 = vector.extract_strided_slice %94 {offsets = [0, 0], sizes = [1, 1], strides = [1, 1]} : vector<2x1xf32> to vector<1x1xf32>
    %105 = vector.extract_strided_slice %100 {offsets = [1, 0], sizes = [1, 8], strides = [1, 1]} : vector<2x8xf32> to vector<1x8xf32>
    %106 = vector.extract_strided_slice %94 {offsets = [1, 0], sizes = [1, 1], strides = [1, 1]} : vector<2x1xf32> to vector<1x1xf32>
    %107 = tpu.concatenate %103, %104, %105, %106, %102 in 1 : vector<1x8xf32>, vector<1x1xf32>, vector<1x8xf32>, vector<1x1xf32>, vector<1x3xf32> -> vector<1x21xf32>
    %c0_50 = arith.constant 0 : index
    %c0_51 = arith.constant 0 : index
    %108 = vector.load %arg9[%c0_50, %c0_51] : memref<1x21xf32, #tpu.memory_space<vmem>>, vector<1x21xf32>
    %109 = arith.mulf %107, %108 : vector<1x21xf32>
    %c0_52 = arith.constant 0 : index
    %c0_53 = arith.constant 0 : index
    %110 = vector.load %arg10[%c0_52, %c0_53] : memref<1x21xf32, #tpu.memory_space<vmem>>, vector<1x21xf32>
    %111 = arith.addf %109, %110 : vector<1x21xf32>
    %cst_54 = arith.constant 0.000000e+00 : f32
    %112 = vector.broadcast %cst_54 : f32 to vector<1x21xf32>
    %113 = arith.maximumf %111, %112 : vector<1x21xf32>
    %c0_55 = arith.constant 0 : index
    %c0_56 = arith.constant 0 : index
    %114 = vector.load %arg11[%c0_55, %c0_56] : memref<21x128xf32, #tpu.memory_space<vmem>>, vector<21x128xf32>
    %cst_57 = arith.constant dense<0.000000e+00> : vector<1x128xf32>
    %115 = tpu.matmul %113, %114, %cst_57 {dimension_numbers = #tpu.dot_dimension_numbers<[1], [0], [0], [1], [0, 0, 1, 1], [], []>} : vector<1x21xf32>, vector<21x128xf32>, vector<1x128xf32> -> vector<1x128xf32>
    %c0_58 = arith.constant 0 : index
    %c0_59 = arith.constant 0 : index
    %116 = vector.load %arg12[%c0_58, %c0_59] : memref<1x128xf32, #tpu.memory_space<vmem>>, vector<1x128xf32>
    %117 = arith.addf %115, %116 : vector<1x128xf32>
    %cst_60 = arith.constant 0.000000e+00 : f32
    %118 = vector.broadcast %cst_60 : f32 to vector<1x128xf32>
    %119 = arith.maximumf %117, %118 : vector<1x128xf32>
    %c0_61 = arith.constant 0 : index
    %c0_62 = arith.constant 0 : index
    %120 = vector.load %arg13[%c0_61, %c0_62] : memref<128x128xf32, #tpu.memory_space<vmem>>, vector<128x128xf32>
    %cst_63 = arith.constant dense<0.000000e+00> : vector<1x128xf32>
    %121 = tpu.matmul %119, %120, %cst_63 {dimension_numbers = #tpu.dot_dimension_numbers<[1], [0], [0], [1], [0, 0, 1, 1], [], []>} : vector<1x128xf32>, vector<128x128xf32>, vector<1x128xf32> -> vector<1x128xf32>
    %c0_64 = arith.constant 0 : index
    %c0_65 = arith.constant 0 : index
    %122 = vector.load %arg14[%c0_64, %c0_65] : memref<1x128xf32, #tpu.memory_space<vmem>>, vector<1x128xf32>
    %123 = arith.addf %121, %122 : vector<1x128xf32>
    %cst_66 = arith.constant 0.000000e+00 : f32
    %124 = vector.broadcast %cst_66 : f32 to vector<1x128xf32>
    %125 = arith.maximumf %123, %124 : vector<1x128xf32>
    %c0_67 = arith.constant 0 : index
    %c0_68 = arith.constant 0 : index
    %126 = vector.load %arg15[%c0_67, %c0_68] : memref<128x128xf32, #tpu.memory_space<vmem>>, vector<128x128xf32>
    %cst_69 = arith.constant dense<0.000000e+00> : vector<1x128xf32>
    %127 = tpu.matmul %125, %126, %cst_69 {dimension_numbers = #tpu.dot_dimension_numbers<[1], [0], [0], [1], [0, 0, 1, 1], [], []>} : vector<1x128xf32>, vector<128x128xf32>, vector<1x128xf32> -> vector<1x128xf32>
    %c0_70 = arith.constant 0 : index
    %c0_71 = arith.constant 0 : index
    %128 = vector.load %arg16[%c0_70, %c0_71] : memref<1x128xf32, #tpu.memory_space<vmem>>, vector<1x128xf32>
    %129 = arith.addf %127, %128 : vector<1x128xf32>
    %cst_72 = arith.constant 0.000000e+00 : f32
    %130 = vector.broadcast %cst_72 : f32 to vector<1x128xf32>
    %131 = arith.maximumf %129, %130 : vector<1x128xf32>
    %c0_73 = arith.constant 0 : index
    %c0_74 = arith.constant 0 : index
    %132 = vector.load %arg17[%c0_73, %c0_74] : memref<128x1xf32, #tpu.memory_space<vmem>>, vector<128x1xf32>
    %cst_75 = arith.constant dense<0.000000e+00> : vector<1x1xf32>
    %133 = tpu.matmul %131, %132, %cst_75 {dimension_numbers = #tpu.dot_dimension_numbers<[1], [0], [0], [1], [0, 0, 1, 1], [], []>} : vector<1x128xf32>, vector<128x1xf32>, vector<1x1xf32> -> vector<1x1xf32>
    %c0_76 = arith.constant 0 : index
    %c0_77 = arith.constant 0 : index
    %134 = vector.load %arg18[%c0_76, %c0_77] : memref<1x1xf32, #tpu.memory_space<vmem>>, vector<1x1xf32>
    %135 = arith.addf %133, %134 : vector<1x1xf32>
    %136 = vector.extract_strided_slice %71 {offsets = [0, 0], sizes = [1, 1], strides = [1, 1]} : vector<2x1xf32> to vector<1x1xf32>
    %c0_78 = arith.constant 0 : index
    %c0_79 = arith.constant 0 : index
    %c0_80 = arith.constant 0 : index
    %137 = vector.load %arg20[%c0_78, %c0_79, %c0_80] : memref<1x1x128xf32, #tpu.memory_space<vmem>>, vector<1x1x1xf32>
    %138 = vector.shape_cast %137 : vector<1x1x1xf32> to vector<1x1xf32>
    %139 = vector.shape_cast %136 : vector<1x1xf32> to vector<1x1x1xf32>
    tpu.vector_store %arg20[%c0_78, %c0_79, %c0_80], %139 {strides = array<i32>} : memref<1x1x128xf32, #tpu.memory_space<vmem>>, vector<1x1x1xf32>,
    %140 = vector.extract_strided_slice %78 {offsets = [0, 0], sizes = [1, 1], strides = [1, 1]} : vector<2x1xf32> to vector<1x1xf32>
    %c0_81 = arith.constant 0 : index
    %c0_82 = arith.constant 0 : index
    %c1 = arith.constant 1 : index
    %141 = vector.load %arg20[%c0_81, %c0_82, %c1] : memref<1x1x128xf32, #tpu.memory_space<vmem>>, vector<1x1x1xf32>
    %142 = vector.shape_cast %141 : vector<1x1x1xf32> to vector<1x1xf32>
    %143 = vector.shape_cast %140 : vector<1x1xf32> to vector<1x1x1xf32>
    tpu.vector_store %arg20[%c0_81, %c0_82, %c1], %143 {strides = array<i32>} : memref<1x1x128xf32, #tpu.memory_space<vmem>>, vector<1x1x1xf32>,
    %144 = vector.extract_strided_slice %94 {offsets = [0, 0], sizes = [1, 1], strides = [1, 1]} : vector<2x1xf32> to vector<1x1xf32>
    %c0_83 = arith.constant 0 : index
    %c0_84 = arith.constant 0 : index
    %c2 = arith.constant 2 : index
    %145 = vector.load %arg20[%c0_83, %c0_84, %c2] : memref<1x1x128xf32, #tpu.memory_space<vmem>>, vector<1x1x1xf32>
    %146 = vector.shape_cast %145 : vector<1x1x1xf32> to vector<1x1xf32>
    %147 = vector.shape_cast %144 : vector<1x1xf32> to vector<1x1x1xf32>
    tpu.vector_store %arg20[%c0_83, %c0_84, %c2], %147 {strides = array<i32>} : memref<1x1x128xf32, #tpu.memory_space<vmem>>, vector<1x1x1xf32>,
    %148 = vector.extract_strided_slice %71 {offsets = [1, 0], sizes = [1, 1], strides = [1, 1]} : vector<2x1xf32> to vector<1x1xf32>
    %c0_85 = arith.constant 0 : index
    %c0_86 = arith.constant 0 : index
    %c3 = arith.constant 3 : index
    %149 = vector.load %arg20[%c0_85, %c0_86, %c3] : memref<1x1x128xf32, #tpu.memory_space<vmem>>, vector<1x1x1xf32>
    %150 = vector.shape_cast %149 : vector<1x1x1xf32> to vector<1x1xf32>
    %151 = vector.shape_cast %148 : vector<1x1xf32> to vector<1x1x1xf32>
    tpu.vector_store %arg20[%c0_85, %c0_86, %c3], %151 {strides = array<i32>} : memref<1x1x128xf32, #tpu.memory_space<vmem>>, vector<1x1x1xf32>,
    %152 = vector.extract_strided_slice %78 {offsets = [1, 0], sizes = [1, 1], strides = [1, 1]} : vector<2x1xf32> to vector<1x1xf32>
    %c0_87 = arith.constant 0 : index
    %c0_88 = arith.constant 0 : index
    %c4 = arith.constant 4 : index
    %153 = vector.load %arg20[%c0_87, %c0_88, %c4] : memref<1x1x128xf32, #tpu.memory_space<vmem>>, vector<1x1x1xf32>
    %154 = vector.shape_cast %153 : vector<1x1x1xf32> to vector<1x1xf32>
    %155 = vector.shape_cast %152 : vector<1x1xf32> to vector<1x1x1xf32>
    tpu.vector_store %arg20[%c0_87, %c0_88, %c4], %155 {strides = array<i32>} : memref<1x1x128xf32, #tpu.memory_space<vmem>>, vector<1x1x1xf32>,
    %156 = vector.extract_strided_slice %94 {offsets = [1, 0], sizes = [1, 1], strides = [1, 1]} : vector<2x1xf32> to vector<1x1xf32>
    %c0_89 = arith.constant 0 : index
    %c0_90 = arith.constant 0 : index
    %c5 = arith.constant 5 : index
    %157 = vector.load %arg20[%c0_89, %c0_90, %c5] : memref<1x1x128xf32, #tpu.memory_space<vmem>>, vector<1x1x1xf32>
    %158 = vector.shape_cast %157 : vector<1x1x1xf32> to vector<1x1xf32>
    %159 = vector.shape_cast %156 : vector<1x1xf32> to vector<1x1x1xf32>
    tpu.vector_store %arg20[%c0_89, %c0_90, %c5], %159 {strides = array<i32>} : memref<1x1x128xf32, #tpu.memory_space<vmem>>, vector<1x1x1xf32>,
    %c0_91 = arith.constant 0 : index
    %c0_92 = arith.constant 0 : index
    %c6 = arith.constant 6 : index
    %160 = vector.load %arg20[%c0_91, %c0_92, %c6] : memref<1x1x128xf32, #tpu.memory_space<vmem>>, vector<1x1x1xf32>
    %161 = vector.shape_cast %160 : vector<1x1x1xf32> to vector<1x1xf32>
    %162 = vector.shape_cast %135 : vector<1x1xf32> to vector<1x1x1xf32>
    tpu.vector_store %arg20[%c0_91, %c0_92, %c6], %162 {strides = array<i32>} : memref<1x1x128xf32, #tpu.memory_space<vmem>>, vector<1x1x1xf32>,
    %c0_93 = arith.constant 0 : index
    %c0_94 = arith.constant 0 : index
    %c7 = arith.constant 7 : index
    %163 = vector.load %arg20[%c0_93, %c0_94, %c7] : memref<1x1x128xf32, #tpu.memory_space<vmem>>, vector<1x1x21xf32>
    %164 = vector.shape_cast %163 : vector<1x1x21xf32> to vector<1x21xf32>
    %165 = vector.shape_cast %107 : vector<1x21xf32> to vector<1x1x21xf32>
    tpu.vector_store %arg20[%c0_93, %c0_94, %c7], %165 {strides = array<i32>} : memref<1x1x128xf32, #tpu.memory_space<vmem>>, vector<1x1x21xf32>,
    %cst_95 = arith.constant 0.000000e+00 : f32
    %166 = vector.broadcast %cst_95 : f32 to vector<1x100xf32>
    %c0_96 = arith.constant 0 : index
    %c0_97 = arith.constant 0 : index
    %c28 = arith.constant 28 : index
    %167 = vector.load %arg20[%c0_96, %c0_97, %c28] : memref<1x1x128xf32, #tpu.memory_space<vmem>>, vector<1x1x100xf32>
    %168 = vector.shape_cast %167 : vector<1x1x100xf32> to vector<1x100xf32>
    %169 = vector.shape_cast %166 : vector<1x100xf32> to vector<1x1x100xf32>
    tpu.vector_store %arg20[%c0_96, %c0_97, %c28], %169 {strides = array<i32>} : memref<1x1x128xf32, #tpu.memory_space<vmem>>, vector<1x1x100xf32>,
    return
  }
  func.func @transform_0(%arg0: i32) -> (i32, i32, i32) {
    %c0_i32 = arith.constant 0 : i32
    %c0_i32_0 = arith.constant 0 : i32
    %c0_i32_1 = arith.constant 0 : i32
    return %arg0, %c0_i32, %c0_i32_0 : i32, i32, i32
  }
  func.func @transform_1(%arg0: i32) -> (i32, i32) {
    %c0_i32 = arith.constant 0 : i32
    %c0_i32_0 = arith.constant 0 : i32
    %c0_i32_1 = arith.constant 0 : i32
    return %c0_i32, %c0_i32_0 : i32, i32
  }
  func.func @transform_2(%arg0: i32) -> (i32, i32) {
    %c0_i32 = arith.constant 0 : i32
    %c0_i32_0 = arith.constant 0 : i32
    %c0_i32_1 = arith.constant 0 : i32
    return %c0_i32, %c0_i32_0 : i32, i32
  }
  func.func @transform_3(%arg0: i32) -> (i32, i32, i32) {
    %c0_i32 = arith.constant 0 : i32
    %c0_i32_0 = arith.constant 0 : i32
    %c0_i32_1 = arith.constant 0 : i32
    %c0_i32_2 = arith.constant 0 : i32
    return %c0_i32, %c0_i32_0, %c0_i32_1 : i32, i32, i32
  }
  func.func @transform_4(%arg0: i32) -> (i32, i32, i32) {
    %c0_i32 = arith.constant 0 : i32
    %c0_i32_0 = arith.constant 0 : i32
    %c0_i32_1 = arith.constant 0 : i32
    %c0_i32_2 = arith.constant 0 : i32
    return %c0_i32, %c0_i32_0, %c0_i32_1 : i32, i32, i32
  }
  func.func @transform_5(%arg0: i32) -> (i32, i32) {
    %c0_i32 = arith.constant 0 : i32
    %c0_i32_0 = arith.constant 0 : i32
    %c0_i32_1 = arith.constant 0 : i32
    return %c0_i32, %c0_i32_0 : i32, i32
  }
  func.func @transform_6(%arg0: i32) -> (i32, i32) {
    %c0_i32 = arith.constant 0 : i32
    %c0_i32_0 = arith.constant 0 : i32
    %c0_i32_1 = arith.constant 0 : i32
    return %c0_i32, %c0_i32_0 : i32, i32
  }
  func.func @transform_7(%arg0: i32) -> (i32, i32, i32) {
    %c0_i32 = arith.constant 0 : i32
    %c0_i32_0 = arith.constant 0 : i32
    %c0_i32_1 = arith.constant 0 : i32
    return %arg0, %c0_i32, %c0_i32_0 : i32, i32, i32
  }
  func.func @transform_8(%arg0: i32) -> (i32, i32) {
    %c0_i32 = arith.constant 0 : i32
    %c0_i32_0 = arith.constant 0 : i32
    %c0_i32_1 = arith.constant 0 : i32
    return %c0_i32, %c0_i32_0 : i32, i32
  }
  func.func @transform_9(%arg0: i32) -> (i32, i32) {
    %c0_i32 = arith.constant 0 : i32
    %c0_i32_0 = arith.constant 0 : i32
    %c0_i32_1 = arith.constant 0 : i32
    return %c0_i32, %c0_i32_0 : i32, i32
  }
  func.func @transform_10(%arg0: i32) -> (i32, i32) {
    %c0_i32 = arith.constant 0 : i32
    %c0_i32_0 = arith.constant 0 : i32
    %c0_i32_1 = arith.constant 0 : i32
    return %c0_i32, %c0_i32_0 : i32, i32
  }
  func.func @transform_11(%arg0: i32) -> (i32, i32) {
    %c0_i32 = arith.constant 0 : i32
    %c0_i32_0 = arith.constant 0 : i32
    %c0_i32_1 = arith.constant 0 : i32
    return %c0_i32, %c0_i32_0 : i32, i32
  }
  func.func @transform_12(%arg0: i32) -> (i32, i32) {
    %c0_i32 = arith.constant 0 : i32
    %c0_i32_0 = arith.constant 0 : i32
    %c0_i32_1 = arith.constant 0 : i32
    return %c0_i32, %c0_i32_0 : i32, i32
  }
  func.func @transform_13(%arg0: i32) -> (i32, i32) {
    %c0_i32 = arith.constant 0 : i32
    %c0_i32_0 = arith.constant 0 : i32
    %c0_i32_1 = arith.constant 0 : i32
    return %c0_i32, %c0_i32_0 : i32, i32
  }
  func.func @transform_14(%arg0: i32) -> (i32, i32) {
    %c0_i32 = arith.constant 0 : i32
    %c0_i32_0 = arith.constant 0 : i32
    %c0_i32_1 = arith.constant 0 : i32
    return %c0_i32, %c0_i32_0 : i32, i32
  }
  func.func @transform_15(%arg0: i32) -> (i32, i32) {
    %c0_i32 = arith.constant 0 : i32
    %c0_i32_0 = arith.constant 0 : i32
    %c0_i32_1 = arith.constant 0 : i32
    return %c0_i32, %c0_i32_0 : i32, i32
  }
  func.func @transform_16(%arg0: i32) -> (i32, i32) {
    %c0_i32 = arith.constant 0 : i32
    %c0_i32_0 = arith.constant 0 : i32
    %c0_i32_1 = arith.constant 0 : i32
    return %c0_i32, %c0_i32_0 : i32, i32
  }
  func.func @transform_17(%arg0: i32) -> (i32, i32) {
    %c0_i32 = arith.constant 0 : i32
    %c0_i32_0 = arith.constant 0 : i32
    %c0_i32_1 = arith.constant 0 : i32
    return %c0_i32, %c0_i32_0 : i32, i32
  }
  func.func @transform_18(%arg0: i32) -> (i32, i32, i32) {
    %c0_i32 = arith.constant 0 : i32
    %c0_i32_0 = arith.constant 0 : i32
    %c0_i32_1 = arith.constant 0 : i32
    return %arg0, %c0_i32, %c0_i32_0 : i32, i32, i32
  }
  func.func @transform_19(%arg0: i32) -> (i32, i32, i32) {
    %c0_i32 = arith.constant 0 : i32
    %c0_i32_0 = arith.constant 0 : i32
    %c0_i32_1 = arith.constant 0 : i32
    return %arg0, %c0_i32, %c0_i32_0 : i32, i32, i32
  }
}

</mosaic_0001>

<bundles_post_ra>
// kernel: _lambda_.1
= control target key start
LH: loop header
LB: loop body
LE: loop exit
PB: predicated region body
PF: predicated region fallthrough
CT: control target
= control target key end

     0   :  { %s3690_s0 = inlined_call_operand.vmem [shape: f32[2,6,128], index: 0, kind: input, shape index: {}]   ;;  %s3691_s1 = inlined_call_operand.hbm [shape: f32[16,6], index: 1, kind: input, shape index: {}]   ;;  %s3692_s2 = inlined_call_operand.vmem [shape: f32[16,1], index: 2, kind: input, shape index: {}]   ;;  %s3693_s3 = inlined_call_operand.hbm [shape: f32[2,128,32], index: 3, kind: input, shape index: {}]   ;;  %s3694_s4 = inlined_call_operand.hbm [shape: f32[2,128,32], index: 4, kind: input, shape index: {}]   ;;  %s3695_s5 = inlined_call_operand.vmem [shape: f32[2,32], index: 5, kind: input, shape index: {}]   ;;  %s3696_s6 = inlined_call_operand.vmem [shape: f32[32,32], index: 6, kind: input, shape index: {}]   ;;  %s3697_s7 = inlined_call_operand.vmem [shape: f32[2,1,5], index: 7, kind: input, shape index: {}]   ;;  %s3698_s8 = inlined_call_operand.vmem [shape: f32[1,21], index: 8, kind: input, shape index: {}]   ;;  %s3699_s9 = inlined_call_operand.vmem [shape: f32[1,21], index: 9, kind: input, shape index: {}]   ;;  %s3700_s10 = inlined_call_operand.vmem [shape: f32[21,128], index: 10, kind: input, shape index: {}]   ;;  %s3701_s11 = inlined_call_operand.vmem [shape: f32[1,128], index: 11, kind: input, shape index: {}]   ;;  %s3702_s12 = inlined_call_operand.hbm [shape: f32[128,128], index: 12, kind: input, shape index: {}]   ;;  %s3703_s13 = inlined_call_operand.vmem [shape: f32[1,128], index: 13, kind: input, shape index: {}]   ;;  %s3704_s14 = inlined_call_operand.hbm [shape: f32[128,128], index: 14, kind: input, shape index: {}]   ;;  %s3705_s15 = inlined_call_operand.vmem [shape: f32[1,128], index: 15, kind: input, shape index: {}]   ;;  %s3706_s16 = inlined_call_operand.hbm [shape: f32[128,1], index: 16, kind: input, shape index: {}]   ;;  %s3707_s17 = inlined_call_operand.<no memory space> [shape: f32[1,1], index: 17, kind: input, shape index: {}]   ;;  %s3708_s18 = inlined_call_operand.vmem [shape: f32[2,16,128], index: 18, kind: output, shape index: {0}]   ;;  %s3709_s19 = inlined_call_operand.vmem [shape: f32[2,1,128], index: 19, kind: output, shape index: {1}]  }
   0x1   :  { %3717 = sst [smem:[#allocation18_spill]] %s3690_s0  ;;  %v25_v0 = vstv %s3707_s17 }
   0x2   :  { %3718 = sst [smem:[#allocation19_spill]] %s3691_s1  ;;  %26 = vst [vmem:[#allocation2] sm:$0x1] %v25_v0 }
   0x3   :  { %3719 = sst [smem:[#allocation20_spill]] %s3692_s2 }
   0x4   :  { %3720 = sst [smem:[#allocation21_spill]] %s3693_s3 }
   0x5   :  { %3721 = sst [smem:[#allocation22_spill]] %s3701_s11 }
   0x6   :  { %3722 = sst [smem:[#allocation23_spill]] %s3703_s13 }
   0x7   :  { %3723 = sst [smem:[#allocation24_spill]] %s3705_s15 }
   0x8   :  { %3724 = sst [smem:[#allocation25_spill]] %s3709_s19 }
   0x9   :  { %27 = vsyncpa [#allocation4], 0 }
   0xa   :  { %28 = vsyncpa [#allocation6], 0 }
   0xb   :  { %29 = vsyncpa [#allocation9], 0 }
   0xc   :  { %30 = vsyncpa [#allocation12], 0  ;;  %s3230_s20 = smov 0  }
   0xd LB: > { %3725 = sst [smem:[#allocation17_spill]] %s3108_s20  ;;  %s3236_s21 = sadd.s32 4294967295, %s3108_s20   ;;  %s3108_s20 = sphi %s3230_s20, %s36_s20  }
   0xe   : > { %p2179_p0 = scmp.ge.s32.totalorder %s3108_s20, 1  ;;  %p481_p1 = scmp.lt.s32.totalorder %s3108_s20, 3 }
   0xf   : > { %p3714_p2 = scmp.eq.s32.totalorder %s3236_s21, 0  ;;  %s3110_s1 = smov [#allocation5]  }
  0x10   : > { %p3241_p3 = pnand %p2179_p0, %p481_p1  ;;  %s509_s22 = sshll.u32 %s3110_s1, 4  ;;  %s3245_s22 = int_to_ptr.vmem [resolvable:$true] %s509_s22 }
  0x11   : > { %s3111_s2 = smov [#allocation8]   ;;  %s3112_s25 = smov [#allocation3]  }
  0x12   : > { %s3726_s17 = scalar_select %p3241_p3, 1, 0 }
  0x13   : > { %p2836_p4 = pneg %p3241_p3  ;;  %s553_s23 = sshll.u32 %s3111_s2, 4  ;;  %s3249_s23 = int_to_ptr.vmem [resolvable:$true] %s553_s23 }
  0x14   : > { %s493_s3 = sshll.u32 %s3112_s25, 4  ;;  %s3113_s26 = smov [#allocation7]   ;;  %s3257_s3 = int_to_ptr.vmem [resolvable:$true] %s493_s3 }
  0x15   : > { %p3253_p5 = pnand %p3714_p2, %p2836_p4  ;;  %s3259_s27 = sshll.u32 %s3113_s26, 4  ;;  %s523_s27 = int_to_ptr.vmem [resolvable:$true] %s3259_s27 }
  0x16   : > { %s3728_s0 = sld [smem:[#allocation21_spill]] }
  0x17   : > { %p3269_p7 = pneg %p3253_p5 }
  0x1c   : > { %s2918_s30 = scalar_lea.hbm %s3728_s0, 4096 }
  0x1d   : > { %p2919_p6 = scmp.ne.s32.totalorder %s3728_s0, %s2918_s30  ;;  %p2925_p10 = scmp.lt.u32.totalorder %s2918_s30, %s3728_s0 }
  0x1f   : > { %p2921_p8 = pnand %p3269_p7, %p2919_p6 }
  0x21   : > { %p2922_p9 = pneg %p2921_p8 }
  0x23   : > { %p2927_p11 = pnand %p2925_p10, %p2922_p9 }
  0x25   : > { %2930 = shalt.err (!%p2927_p11)
}
  0x26   : > { %s2931_s28 = scalar_lea.vmem %s3245_s22, 4096  ;;  %p2939_p1 = scmp.lt.s32.totalorder %s3245_s22, %s3245_s22 }
  0x27   : > { %p2932_p12 = scmp.ne.s32.totalorder %s3245_s22, %s2931_s28  ;;  %p2940_p4 = scmp.lt.s32.totalorder %s2931_s28, %s2931_s28 }
  0x29   : > { %p2934_p13 = pnand %p2932_p12, %p3269_p7  ;;  %p2941_p6 = por %p2940_p4, %p2939_p1 }
  0x2b   : > { %p2935_p0 = pneg %p2934_p13 }
  0x2d   : > { %p2942_p8 = pnand %p2941_p6, %p2935_p0 }
  0x2f   : > { %2945 = shalt.err (!%p2942_p8)
}
  0x30   : > { %s3114_s29 = smov 128   ;;  %s3115_s30 = smov 8  }
  0x31   : > { %2842 = dma.hbm_to_vmem [thread:$0]  (!%p3253_p5), %s3728_s0, 4096, %s3245_s22, [#allocation6], %s3114_s29, %s3114_s29, %s3115_s30  }
  0x32   : > { %s2946_s28 = scalar_lea.hbm %s3702_s12, 2048 }
  0x33   : > { %p2947_p9 = scmp.ne.s32.totalorder %s3702_s12, %s2946_s28  ;;  %p2953_p12 = scmp.lt.u32.totalorder %s2946_s28, %s3702_s12 }
  0x35   : > { %p2949_p10 = pnand %p2947_p9, %p3269_p7 }
  0x37   : > { %p2950_p11 = pneg %p2949_p10 }
  0x39   : > { %p2955_p13 = pnand %p2953_p12, %p2950_p11 }
  0x3b   : > { %2958 = shalt.err (!%p2955_p13)
}
  0x3c   : > { %s2959_s22 = scalar_lea.vmem %s3249_s23, 2048  ;;  %p2967_p6 = scmp.lt.s32.totalorder %s3249_s23, %s3249_s23 }
  0x3d   : > { %p2960_p0 = scmp.ne.s32.totalorder %s3249_s23, %s2959_s22  ;;  %p2968_p8 = scmp.lt.s32.totalorder %s2959_s22, %s2959_s22 }
  0x3f   : > { %p2962_p1 = pnand %p2960_p0, %p3269_p7  ;;  %p2969_p9 = por %p2968_p8, %p2967_p6 }
  0x41   : > { %p2963_p4 = pneg %p2962_p1 }
  0x43   : > { %p2970_p10 = pnand %p2969_p9, %p2963_p4 }
  0x45   : > { %2973 = shalt.err (!%p2970_p10)
}
  0x46   : > { %2848 = dma.hbm_to_vmem [thread:$0]  (!%p3253_p5), %s3702_s12, 2048, %s3249_s23, [#allocation9], %s3114_s29, %s3114_s29, %s3115_s30  }
  0x47   : > { %s3730_s1 = sld [smem:[#allocation19_spill]] }
  0x4d   : > { %s2974_s2 = scalar_lea.hbm %s3730_s1, 256 }
  0x4e   : > { %p2975_p11 = scmp.ne.s32.totalorder %s3730_s1, %s2974_s2  ;;  %p2981_p0 = scmp.lt.u32.totalorder %s2974_s2, %s3730_s1 }
  0x50   : > { %p2977_p12 = pnand %p2975_p11, %p3269_p7 }
  0x52   : > { %p2978_p13 = pneg %p2977_p12 }
  0x54   : > { %p2983_p1 = pnand %p2981_p0, %p2978_p13 }
  0x56   : > { %2986 = shalt.err (!%p2983_p1)
}
  0x57   : > { %s2987_s23 = scalar_lea.vmem %s3257_s3, 256  ;;  %p2995_p9 = scmp.lt.s32.totalorder %s3257_s3, %s3257_s3 }
  0x58   : > { %p2988_p4 = scmp.ne.s32.totalorder %s3257_s3, %s2987_s23  ;;  %p2996_p10 = scmp.lt.s32.totalorder %s2987_s23, %s2987_s23 }
  0x5a   : > { %p2990_p6 = pnand %p2988_p4, %p3269_p7  ;;  %p2997_p11 = por %p2996_p10, %p2995_p9 }
  0x5c   : > { %p2991_p8 = pneg %p2990_p6 }
  0x5e   : > { %p2998_p12 = pnand %p2997_p11, %p2991_p8 }
  0x60   : > { %3001 = shalt.err (!%p2998_p12)
}
  0x61   : > { %2839 = dma.hbm_to_vmem [thread:$0]  (!%p3253_p5), %s3730_s1, 256, %s3257_s3, [#allocation4], %s3114_s29, %s3114_s29, %s3115_s30  }
  0x62   : > { %s3002_s2 = scalar_lea.hbm %s3694_s4, 4096 }
  0x63   : > { %p3003_p13 = scmp.ne.s32.totalorder %s3694_s4, %s3002_s2  ;;  %p3009_p4 = scmp.lt.u32.totalorder %s3002_s2, %s3694_s4 }
  0x65   : > { %p3005_p0 = pnand %p3003_p13, %p3269_p7 }
  0x67   : > { %p3006_p1 = pneg %p3005_p0 }
  0x69   : > { %p3011_p6 = pnand %p3009_p4, %p3006_p1 }
  0x6b   : > { %3014 = shalt.err (!%p3011_p6)
}
  0x6c   : > { %s3015_s23 = scalar_lea.vmem %s523_s27, 4096  ;;  %p3023_p11 = scmp.lt.s32.totalorder %s523_s27, %s523_s27 }
  0x6d   : > { %p3016_p8 = scmp.ne.s32.totalorder %s523_s27, %s3015_s23  ;;  %p3024_p12 = scmp.lt.s32.totalorder %s3015_s23, %s3015_s23 }
  0x6f   : > { %p3018_p9 = pnand %p3016_p8, %p3269_p7  ;;  %p3025_p2 = por %p3024_p12, %p3023_p11 }
  0x71   : > { %p3019_p10 = pneg %p3018_p9 }
  0x73   : > { %p3026_p3 = pnand %p3025_p2, %p3019_p10 }
  0x75   : > { %3029 = shalt.err (!%p3026_p3)
}
  0x76   : > { %2845 = dma.hbm_to_vmem [thread:$0]  (!%p3253_p5), %s3694_s4, 4096, %s523_s27, [#allocation6], %s3114_s29, %s3114_s29, %s3115_s30  }
  0x77   : > { %s3116_s13 = smov [#allocation10]   ;;  %s3117_s19 = smov [#allocation11]  }
  0x78   : > { %s569_s15 = sshll.u32 %s3116_s13, 4  ;;  %s585_s2 = sshll.u32 %s3117_s19, 4  ;;  %s570_s15 = int_to_ptr.vmem [resolvable:$true] %s569_s15  ;;  %s586_s2 = int_to_ptr.vmem [resolvable:$true] %s585_s2 }
  0x79   : > { %s3030_s28 = scalar_lea.hbm %s3704_s14, 2048 }
  0x7a   : > { %p3031_p2 = scmp.ne.s32.totalorder %s3704_s14, %s3030_s28  ;;  %p3037_p0 = scmp.lt.u32.totalorder %s3030_s28, %s3704_s14 }
  0x7c   : > { %p3033_p3 = pnand %p3031_p2, %p3269_p7 }
  0x7e   : > { %p3034_p13 = pneg %p3033_p3 }
  0x80   : > { %p3039_p1 = pnand %p3037_p0, %p3034_p13 }
  0x82   : > { %3042 = shalt.err (!%p3039_p1)
}
  0x83   : > { %s3043_s27 = scalar_lea.vmem %s570_s15, 2048  ;;  %p3051_p9 = scmp.lt.s32.totalorder %s570_s15, %s570_s15 }
  0x84   : > { %p3044_p4 = scmp.ne.s32.totalorder %s570_s15, %s3043_s27  ;;  %p3052_p10 = scmp.lt.s32.totalorder %s3043_s27, %s3043_s27 }
  0x86   : > { %p3046_p6 = pnand %p3044_p4, %p3269_p7  ;;  %p3053_p11 = por %p3052_p10, %p3051_p9 }
  0x88   : > { %p3047_p8 = pneg %p3046_p6 }
  0x8a   : > { %p3054_p12 = pnand %p3053_p11, %p3047_p8 }
  0x8c   : > { %3057 = shalt.err (!%p3054_p12)
}
  0x8d   : > { %2851 = dma.hbm_to_vmem [thread:$0]  (!%p3253_p5), %s3704_s14, 2048, %s570_s15, [#allocation9], %s3114_s29, %s3114_s29, %s3115_s30  }
  0x8e   : > { %s3058_s25 = scalar_lea.hbm %s3706_s16, 2048 }
  0x8f   : > { %p3059_p2 = scmp.ne.s32.totalorder %s3706_s16, %s3058_s25  ;;  %p3065_p0 = scmp.lt.u32.totalorder %s3058_s25, %s3706_s16 }
  0x91   : > { %p3061_p3 = pnand %p3059_p2, %p3269_p7 }
  0x93   : > { %p3062_p13 = pneg %p3061_p3 }
  0x95   : > { %p3067_p1 = pnand %p3065_p0, %p3062_p13 }
  0x97   : > { %3070 = shalt.err (!%p3067_p1)
}
  0x98   : > { %s3071_s3 = scalar_lea.vmem %s586_s2, 2048  ;;  %p3079_p9 = scmp.lt.s32.totalorder %s586_s2, %s586_s2 }
  0x99   : > { %p3072_p4 = scmp.ne.s32.totalorder %s586_s2, %s3071_s3  ;;  %p3080_p10 = scmp.lt.s32.totalorder %s3071_s3, %s3071_s3 }
  0x9b   : > { %p3074_p6 = pnand %p3072_p4, %p3269_p7  ;;  %p3081_p11 = por %p3080_p10, %p3079_p9 }
  0x9d   : > { %p3075_p8 = pneg %p3074_p6 }
  0x9f   : > { %p3082_p12 = pnand %p3081_p11, %p3075_p8 }
  0xa1   : > { %3085 = shalt.err (!%p3082_p12)
}
  0xa2   : > { %2854 = dma.hbm_to_vmem [thread:$0]  (!%p3253_p5), %s3706_s16, 2048, %s586_s2, [#allocation12], %s3114_s29, %s3114_s29, %s3115_s30  }
  0xa3   : > { %p3731_p2 = scmp.ne.s32.totalorder %s3726_s17, 0 }
  0xa4   : > { %p3732_p7 = scmp.eq.s32.totalorder (!%p3731_p2), %s3236_s21, 0 }
  0xa5   : > { %617 = sbr.rel (%p3731_p2) target bundleno = 2750 (0xabe), region = 92 }
  0xac   : > { %3091 = dma.done.wait (%p3732_p7), [#allocation4], 256   ;;  %p3733_p3 = pmov %p3732_p7 }
  0xae   : > { %3093 = vsyncadd (%p3733_p3), [#allocation4], 4294967040  ;;  %p3734_p13 = pmov %p3733_p3 }
  0xaf   : > { %p3735_p0 = pmov %p3733_p3 }
  0xb0   : > { %3095 = dma.done.wait (%p3734_p13), [#allocation6], 8192  }
  0xb1   : > { %3097 = vsyncadd (%p3735_p0), [#allocation6], 4294959104  ;;  %p3736_p1 = pmov %p3735_p0 }
  0xb2   : > { %p3737_p5 = pmov %p3735_p0 }
  0xb3   : > { %3099 = dma.done.wait (%p3736_p1), [#allocation9], 4096  }
  0xb4   : > { %3101 = vsyncadd (%p3737_p5), [#allocation9], 4294963200  ;;  %p3738_p4 = pmov %p3735_p0 }
  0xb5   : > { %p3739_p6 = pmov %p3735_p0 }
  0xb6   : > { %3103 = dma.done.wait (%p3738_p4), [#allocation12], 2048  }
  0xb7   : > { %3105 = vsyncadd (%p3739_p6), [#allocation12], 4294965248  ;;  %p698_p8 = scmp.lt.s32.totalorder %s3236_s21, 1  ;;  %v3118_v1 = vmov 0   ;;  %v3119_v2 = vmov 0.0|0.0   ;;  %s3740_s29 = sld [smem:[#allocation18_spill]] }
  0xb8   : > { %2892 = vset.pattern.permute.xlu0 %v3118_v1  ;;  %2893 = vset.pattern.permute.xlu1 %v3118_v1  ;;  %vm735_vm0 = vcmask 1045504   ;;  %vm728_vm1 = vcmask 48128   ;;  %v714_v4 = vld [vmem:[#allocation3] sm:$0xff]  ;;  %v715_v5 = vld [vmem:[#allocation3 + $0x8] sm:$0xff]  ;;  %s3741_s11 = sld [smem:[#allocation20_spill]]  ;;  %v832_v8 = vld [vmem:[#allocation5 + $0x80] sm:$0xff] }
  0xb9   : > { %s3748_s21 = smov (!%p698_p8, %s3236_s21), 1  ;;  %2651 = vmatprep.subr.bf16.mxu0 %v3119_v2  ;;  %2348 = vmatprep.mubr.msk.f32.mxu1 %vm728_vm1, %v714_v4  ;;  %v833_v9 = vld [vmem:[#allocation5 + $0x88] sm:$0xff]  ;;  %v816_v10 = vld [vmem:[#allocation5] sm:$0xff]  ;;  %v834_v14 = vld [vmem:[#allocation5 + $0x90] sm:$0xff]  ;;  %vm3120_vm2 = vmmov 0   ;;  %v3121_v56 = vmov 0.0  }
  0xba   : > { %s2194_s20 = sshll.u32 %s3748_s21, 3  ;;  %v817_v11 = vld [vmem:[#allocation5 + $0x8] sm:$0xff]  ;;  %v2652_v12 = vpack.c.bf16 %v833_v9, %v832_v8  ;;  %v835_v15 = vld [vmem:[#allocation5 + $0x98] sm:$0xff]  ;;  %v818_v16 = vld [vmem:[#allocation5 + $0x10] sm:$0xff]  ;;  %2418 = vmatprep.mubr.msk.f32.mxu0 %vm3120_vm2, %v3121_v56  ;;  %s2208_s25 = sshll.u32 %s3748_s21, 4  ;;  %vm1177_vm3 = vcmask 261120  }
  0xbb   : > { %v2628_v13 = vpack.c.bf16 %v817_v11, %v816_v10  ;;  %v819_v17 = vld [vmem:[#allocation5 + $0x18] sm:$0xff]  ;;  %v2655_v18 = vpack.c.bf16 %v835_v15, %v834_v14  ;;  %v836_v20 = vld [vmem:[#allocation5 + $0xa0] sm:$0xff]  ;;  %v837_v21 = vld [vmem:[#allocation5 + $0xa8] sm:$0xff]  ;;  %s709_s22 = scalar_lea.vmem %s3708_s18, %s2208_s25  ;;  %vm1333_vm4 = vcmask 1041409   ;;  %vm1407_vm5 = vcmask 254976   ;;  %s704_s19 = scalar_lea.vmem %s3697_s7, %s3748_s21 }
  0xbc   : > { %2653 = vmatpush3.bf16.msra.mxu0 %v2652_v12  ;;  %v2631_v19 = vpack.c.bf16 %v819_v17, %v818_v16  ;;  %v820_v22 = vld [vmem:[#allocation5 + $0x20] sm:$0xff]  ;;  %v821_v23 = vld [vmem:[#allocation5 + $0x28] sm:$0xff]  ;;  %v2658_v24 = vpack.c.bf16 %v837_v21, %v836_v20  ;;  %v838_v26 = vld [vmem:[#allocation5 + $0xb0] sm:$0xff]  ;;  %s3124_s25 = smov 18   ;;  %vm1664_vm8 = vcmask 1044480   ;;  %vm1643_vm9 = vcmask 64512  }
  0xbd   : > { %s701_s30 = scalar_lea.vmem %s3740_s29, %s2194_s20  ;;  %2654 = vmatprep.subr.bf16.mxu0 %v3119_v2  ;;  %v2634_v25 = vpack.c.bf16 %v821_v23, %v820_v22  ;;  %v839_v27 = vld [vmem:[#allocation5 + $0xb8] sm:$0xff]  ;;  %v822_v28 = vld [vmem:[#allocation5 + $0x30] sm:$0xff]  ;;  %v840_v32 = vld [vmem:[#allocation5 + $0xc0] sm:$0xff]  ;;  %vm1645_vm10 = vcmask 72704   ;;  %vm1647_vm11 = vcmask 138240   ;;  %vm1649_vm12 = vcmask 146432  }
  0xbe   : > { %v713_v3 = vld [vmem:[%s701_s30] sm:$0x3f]  ;;  %v717_v7 = vld [vmem:[%s3741_s11 + $0x8] sm:$0xff]  ;;  %v2661_v30 = vpack.c.bf16 %v839_v27, %v838_v26  ;;  %v824_v34 = vld [vmem:[#allocation5 + $0x40] sm:$0xff]  ;;  %vm1660_vm13 = vcmask 171008   ;;  %vm1425_vm14 = vcmask 257024  }
  0xbf   : > { %2346 = vmatprep.subr.msk.mxu1 %vm735_vm0, %v713_v3  ;;  %v716_v6 = vld [vmem:[%s3741_s11] sm:$0xff]  ;;  %v823_v29 = vld [vmem:[#allocation5 + $0x38] sm:$0xff]  ;;  %v844_v44 = vld [vmem:[#allocation5 + $0xe0] sm:$0xff]  ;;  %s3125_s29 = smov 7   ;;  %s3742_s0 = sld [smem:[#allocation22_spill]]  ;;  %vm2002_vm15 = vcmask 0  }
  0xc0   : > { %2347 = vmatpush3.msk.msra.mxu1 %vm735_vm0, %v713_v3  ;;  %720 = vperm.xlu0 %2892, %v716_v6   ;;  %v2637_v31 = vpack.c.bf16 %v823_v29, %v822_v28  ;;  %v841_v33 = vld [vmem:[#allocation5 + $0xc8] sm:$0xff]  ;;  %v842_v38 = vld [vmem:[#allocation5 + $0xd0] sm:$0xff]  ;;  %v843_v39 = vld [vmem:[#allocation5 + $0xd8] sm:$0xff]  ;;  %vm2004_vm0 = vcmask 8200   ;;  %s3745_s15 = sld [smem:[#allocation24_spill]]  ;;  %s3126_s27 = smov 6  }
  0xc1   : > { %2349 = vmatmul.mubr.msk.f32.vlgmr.msra.gmra.mrb[0].mxu1 %vm728_vm1, %v715_v5  ;;  %2627 = vmatprep.subr.bf16.mxu1 %v3119_v2  ;;  %v825_v35 = vld [vmem:[#allocation5 + $0x48] sm:$0xff]  ;;  %v2664_v36 = vpack.c.bf16 %v841_v33, %v840_v32  ;;  %v826_v40 = vld [vmem:[#allocation5 + $0x50] sm:$0xff]  ;;  %v827_v41 = vld [vmem:[#allocation5 + $0x58] sm:$0xff]  ;;  %v2667_v42 = vpack.c.bf16 %v843_v39, %v842_v38  ;;  %vm2006_vm1 = vcmask 16400  }
  0xc2   : > { %2629 = vmatpush3.bf16.msra.mxu1 %v2628_v13  ;;  %2656 = vmatpush3.bf16.msra.mxu0 %v2655_v18  ;;  %v2640_v37 = vpack.c.bf16 %v825_v35, %v824_v34  ;;  %v2643_v43 = vpack.c.bf16 %v827_v41, %v826_v40  ;;  %v845_v45 = vld [vmem:[#allocation5 + $0xe8] sm:$0xff]  ;;  %v828_v46 = vld [vmem:[#allocation5 + $0x60] sm:$0xff]  ;;  %v846_v50 = vld [vmem:[#allocation5 + $0xf0] sm:$0xff] }
  0xc3   : > { %2630 = vmatprep.subr.bf16.mxu1 %v3119_v2  ;;  %2657 = vmatprep.subr.bf16.mxu0 %v3119_v2  ;;  %v829_v47 = vld [vmem:[#allocation5 + $0x68] sm:$0xff]  ;;  %v2670_v48 = vpack.c.bf16 %v845_v45, %v844_v44  ;;  %v847_v51 = vld [vmem:[#allocation5 + $0xf8] sm:$0xff]  ;;  %v830_v53 = vld [vmem:[#allocation5 + $0x70] sm:$0xff] }
  0xc4   : > { %725 = vperm.xlu0 %2892, %v717_v7   ;;  %v2646_v49 = vpack.c.bf16 %v829_v47, %v828_v46  ;;  %v2673_v52 = vpack.c.bf16 %v847_v51, %v846_v50  ;;  %v831_v54 = vld [vmem:[#allocation5 + $0x78] sm:$0xff]  ;;  %2383 = vmatprep.mubr.msk.f32.mxu1 %vm3120_vm2, %v3121_v56  ;;  %v1004_v58 = vld [vmem:[#allocation7 + $0x80] sm:$0xff]  ;;  %v1005_v59 = vld [vmem:[#allocation7 + $0x88] sm:$0xff] }
  0xc5   : > { %v2649_v55 = vpack.c.bf16 %v831_v54, %v830_v53  ;;  %v988_v60 = vld [vmem:[#allocation7] sm:$0xff]  ;;  %v989_v61 = vld [vmem:[#allocation7 + $0x8] sm:$0xff]  ;;  %v2700_v0 = vpack.c.bf16 %v1005_v59, %v1004_v58  ;;  %v1006_v5 = vld [vmem:[#allocation7 + $0x90] sm:$0xff] }
  0xc6   : > { %2632 = vmatpush3.bf16.msra.mxu1 %v2631_v19  ;;  %2659 = vmatpush3.bf16.msra.mxu0 %v2658_v24  ;;  %v2676_v4 = vpack.c.bf16 %v989_v61, %v988_v60  ;;  %v1007_v6 = vld [vmem:[#allocation7 + $0x98] sm:$0xff]  ;;  %v990_v8 = vld [vmem:[#allocation7 + $0x10] sm:$0xff]  ;;  %v1008_v12 = vld [vmem:[#allocation7 + $0xa0] sm:$0xff] }
  0xc7   : > { %2633 = vmatprep.subr.bf16.mxu1 %v3119_v2  ;;  %2660 = vmatprep.subr.bf16.mxu0 %v3119_v2  ;;  %v991_v9 = vld [vmem:[#allocation7 + $0x18] sm:$0xff]  ;;  %v2703_v10 = vpack.c.bf16 %v1007_v6, %v1006_v5  ;;  %v1009_v13 = vld [vmem:[#allocation7 + $0xa8] sm:$0xff]  ;;  %v992_v14 = vld [vmem:[#allocation7 + $0x20] sm:$0xff] }
  0xc8   : > { %v2679_v11 = vpack.c.bf16 %v991_v9, %v990_v8  ;;  %v993_v15 = vld [vmem:[#allocation7 + $0x28] sm:$0xff]  ;;  %v2706_v16 = vpack.c.bf16 %v1009_v13, %v1008_v12  ;;  %v1010_v18 = vld [vmem:[#allocation7 + $0xb0] sm:$0xff]  ;;  %v1011_v19 = vld [vmem:[#allocation7 + $0xb8] sm:$0xff] }
  0xc9   : > { %v2682_v17 = vpack.c.bf16 %v993_v15, %v992_v14  ;;  %v994_v20 = vld [vmem:[#allocation7 + $0x30] sm:$0xff]  ;;  %v995_v21 = vld [vmem:[#allocation7 + $0x38] sm:$0xff]  ;;  %v2709_v22 = vpack.c.bf16 %v1011_v19, %v1010_v18  ;;  %v1012_v24 = vld [vmem:[#allocation7 + $0xc0] sm:$0xff] }
  0xca   : > { %2635 = vmatpush3.bf16.msra.mxu1 %v2634_v25  ;;  %2662 = vmatpush3.bf16.msra.mxu0 %v2661_v30  ;;  %v2685_v23 = vpack.c.bf16 %v995_v21, %v994_v20  ;;  %v1013_v25 = vld [vmem:[#allocation7 + $0xc8] sm:$0xff]  ;;  %v996_v26 = vld [vmem:[#allocation7 + $0x40] sm:$0xff]  ;;  %v1014_v30 = vld [vmem:[#allocation7 + $0xd0] sm:$0xff] }
  0xcb   : > { %2636 = vmatprep.subr.bf16.mxu1 %v3119_v2  ;;  %2663 = vmatprep.subr.bf16.mxu0 %v3119_v2  ;;  %v997_v27 = vld [vmem:[#allocation7 + $0x48] sm:$0xff]  ;;  %v2712_v28 = vpack.c.bf16 %v1013_v25, %v1012_v24  ;;  %v998_v32 = vld [vmem:[#allocation7 + $0x50] sm:$0xff]  ;;  %v999_v33 = vld [vmem:[#allocation7 + $0x58] sm:$0xff] }
  0xcc   : > { %v2688_v29 = vpack.c.bf16 %v997_v27, %v996_v26  ;;  %v2691_v35 = vpack.c.bf16 %v999_v33, %v998_v32  ;;  %v1000_v38 = vld [vmem:[#allocation7 + $0x60] sm:$0xff]  ;;  %v1001_v39 = vld [vmem:[#allocation7 + $0x68] sm:$0xff]  ;;  %v1002_v44 = vld [vmem:[#allocation7 + $0x70] sm:$0xff] }
  0xcd   : > { %v2694_v41 = vpack.c.bf16 %v1001_v39, %v1000_v38  ;;  %v1003_v45 = vld [vmem:[#allocation7 + $0x78] sm:$0xff] }
  0xce   : > { %2638 = vmatpush3.bf16.msra.mxu1 %v2637_v31  ;;  %2665 = vmatpush3.bf16.msra.mxu0 %v2664_v36  ;;  %v1015_v31 = vld [vmem:[#allocation7 + $0xd8] sm:$0xff]  ;;  %v1016_v36 = vld [vmem:[#allocation7 + $0xe0] sm:$0xff]  ;;  %v2697_v47 = vpack.c.bf16 %v1003_v45, %v1002_v44 }
  0xcf   : > { %2639 = vmatprep.subr.bf16.mxu1 %v3119_v2  ;;  %2666 = vmatprep.subr.bf16.mxu0 %v3119_v2  ;;  %v2715_v34 = vpack.c.bf16 %v1015_v31, %v1014_v30  ;;  %v1171_v51 = vld [vmem:[%s3696_s6 + $0x10] sm:$0xff] }
  0xd2   : > { %2641 = vmatpush3.bf16.msra.mxu1 %v2640_v37  ;;  %2668 = vmatpush3.bf16.msra.mxu0 %v2667_v42  ;;  %v1017_v37 = vld [vmem:[#allocation7 + $0xe8] sm:$0xff]  ;;  %v1018_v42 = vld [vmem:[#allocation7 + $0xf0] sm:$0xff] }
  0xd3   : > { %2642 = vmatprep.subr.bf16.mxu1 %v3119_v2  ;;  %2669 = vmatprep.subr.bf16.mxu0 %v3119_v2  ;;  %v2718_v40 = vpack.c.bf16 %v1017_v37, %v1016_v36 }
  0xd6   : > { %2644 = vmatpush3.bf16.msra.mxu1 %v2643_v43  ;;  %2671 = vmatpush3.bf16.msra.mxu0 %v2670_v48  ;;  %v1019_v43 = vld [vmem:[#allocation7 + $0xf8] sm:$0xff]  ;;  %v1169_v48 = vld [vmem:[%s3696_s6] sm:$0xff] }
  0xd7   : > { %2645 = vmatprep.subr.bf16.mxu1 %v3119_v2  ;;  %2672 = vmatprep.subr.bf16.mxu0 %v3119_v2  ;;  %v2721_v46 = vpack.c.bf16 %v1019_v43, %v1018_v42 }
  0xda   : > { %2647 = vmatpush3.bf16.msra.mxu1 %v2646_v49  ;;  %2674 = vmatpush3.bf16.msra.mxu0 %v2673_v52  ;;  %v1170_v49 = vld [vmem:[%s3696_s6 + $0x8] sm:$0xff]  ;;  %v1172_v52 = vld [vmem:[%s3696_s6 + $0x18] sm:$0xff] }
  0xdb   : > { %2648 = vmatprep.subr.bf16.mxu1 %v3119_v2  ;;  %2699 = vmatprep.subr.bf16.mxu0 %v3119_v2  ;;  %v2723_v50 = vpack.c.bf16 %v1170_v49, %v1169_v48  ;;  %v2727_v53 = vpack.c.bf16 %v1172_v52, %v1171_v51 }
  0xde   : > { %2650 = vmatpush3.bf16.msra.mxu1 %v2649_v55 }
  0xdf   : > { %2675 = vmatprep.subr.bf16.mxu1 %v3119_v2 }
 0x13f   : > { %v721_v57 = vpop.permute.xlu0 %720 }
 0x143   : > { %v726_v62 = vpop.permute.xlu0 %725 }
 0x194   : > { %v2350_v63 = vpop.f32.mrb[0].mxu1 }
 0x195   : > { %v3467_v1 = vadd.f32 %v2350_v63, %v726_v62  ;;  %v805_v3 = vpop.f32.mrb[1].mxu1 }
 0x196   : > { %v3469_v7 = vadd.f32 %v805_v3, %v721_v57 }
 0x197   : > { %815 = vst [vmem:[%s709_s22 + $0x8] sm:$0xff] %v3467_v1  ;;  %2419 = vmatmul.mubr.f32.vlgmr.msra.gmra.mrb[0].mxu0 %v3467_v1 }
 0x198   : > { %814 = vst [vmem:[%s709_s22] sm:$0xff] %v3469_v7  ;;  %2701 = vmatpush3.bf16.msra.mxu0 %v2700_v0  ;;  %2384 = vmatmul.mubr.f32.vlgmr.msra.gmra.mrb[2].mxu1 %v3469_v7  ;;  %s3744_s22 = sld [smem:[#allocation23_spill]] }
 0x199   : > { %2677 = vmatpush3.bf16.msra.mxu1 %v2676_v4  ;;  %2702 = vmatprep.subr.bf16.mxu0 %v3119_v2 }
 0x19a   : > { %2678 = vmatprep.subr.bf16.mxu1 %v3119_v2  ;;  %2488 = vmatprep.mubr.msk.f32.mxu0 %vm3120_vm2, %v3121_v56 }
 0x19b   : > { %2453 = vmatprep.mubr.msk.f32.mxu1 %vm3120_vm2, %v3121_v56 }
 0x19c   : > { %2704 = vmatpush3.bf16.msra.mxu0 %v2703_v10 }
 0x19d   : > { %2680 = vmatpush3.bf16.msra.mxu1 %v2679_v11  ;;  %2705 = vmatprep.subr.bf16.mxu0 %v3119_v2 }
 0x19e   : > { %2681 = vmatprep.subr.bf16.mxu1 %v3119_v2 }
 0x1a0   : > { %2707 = vmatpush3.bf16.msra.mxu0 %v2706_v16 }
 0x1a1   : > { %2683 = vmatpush3.bf16.msra.mxu1 %v2682_v17  ;;  %2708 = vmatprep.subr.bf16.mxu0 %v3119_v2 }
 0x1a2   : > { %2684 = vmatprep.subr.bf16.mxu1 %v3119_v2 }
 0x1a4   : > { %2710 = vmatpush3.bf16.msra.mxu0 %v2709_v22 }
 0x1a5   : > { %2686 = vmatpush3.bf16.msra.mxu1 %v2685_v23  ;;  %2711 = vmatprep.subr.bf16.mxu0 %v3119_v2 }
 0x1a6   : > { %2687 = vmatprep.subr.bf16.mxu1 %v3119_v2 }
 0x1a8   : > { %2713 = vmatpush3.bf16.msra.mxu0 %v2712_v28 }
 0x1a9   : > { %2689 = vmatpush3.bf16.msra.mxu1 %v2688_v29  ;;  %2714 = vmatprep.subr.bf16.mxu0 %v3119_v2 }
 0x1aa   : > { %2690 = vmatprep.subr.bf16.mxu1 %v3119_v2 }
 0x1ac   : > { %2716 = vmatpush3.bf16.msra.mxu0 %v2715_v34 }
 0x1ad   : > { %2692 = vmatpush3.bf16.msra.mxu1 %v2691_v35  ;;  %2717 = vmatprep.subr.bf16.mxu0 %v3119_v2 }
 0x1ae   : > { %2693 = vmatprep.subr.bf16.mxu1 %v3119_v2 }
 0x1b0   : > { %2719 = vmatpush3.bf16.msra.mxu0 %v2718_v40 }
 0x1b1   : > { %2695 = vmatpush3.bf16.msra.mxu1 %v2694_v41  ;;  %2720 = vmatprep.subr.bf16.mxu0 %v3119_v2 }
 0x1b2   : > { %2696 = vmatprep.subr.bf16.mxu1 %v3119_v2 }
 0x1b4   : > { %2722 = vmatpush3.bf16.msra.mxu0 %v2721_v46 }
 0x1b5   : > { %2698 = vmatpush3.bf16.msra.mxu1 %v2697_v47  ;;  %2740 = vmatprep.subr.bf16.mxu0 %v3119_v2 }
 0x1b6   : > { %2724 = vmatprep.subr.bf16.mxu1 %v2723_v50 }
 0x1b7   : > { %2489 = vmatmul.mubr.f32.vlgmr.msra.gmra.mrb[2].mxu0 %v3467_v1 }
 0x1b8   : > { %2454 = vmatmul.mubr.f32.vlgmr.msra.gmra.mrb[4].mxu1 %v3469_v7  ;;  %2554 = vmatprep.mubr.msk.f32.mxu0 %vm3120_vm2, %v3121_v56 }
 0x1b9   : > { %2726 = vmatpush3.bf16.msra.mxu1 %v2723_v50 }
 0x1ba   : > { %2728 = vmatprep.subr.bf16.mxu1 %v2727_v53 }
 0x1bd   : > { %2730 = vmatpush3.bf16.msra.mxu1 %v2727_v53 }
 0x1be   : > { %2731 = vmatprep.subr.bf16.mxu1 %v3119_v2 }
 0x26a   : > { %v3511_v54 = vpop.f32.mrb[0].mxu0 }
 0x26b   : > { %v3513_v55 = vpop.f32.mrb[2].mxu1  ;;  %v2420_v57 = vpop.f32.mrb[1].mxu0  ;;  %v1161_v60 = vmul.f32 %v3511_v54, %v3511_v54 }
 0x26c   : > { %v2385_v58 = vpop.f32.mrb[3].mxu1  ;;  %v1160_v0 = vmul.f32 %v3513_v55, %v3513_v55 }
 0x28a   : > { %v3515_v59 = vpop.f32.mrb[2].mxu0 }
 0x28b   : > { %v1163_v61 = vmul.f32 %v3515_v59, %v3515_v59  ;;  %v3521_v62 = vpop.f32.mrb[4].mxu1  ;;  %v2490_v63 = vpop.f32.mrb[3].mxu0 }
 0x28c   : > { %v1162_v1 = vmul.f32 %v3521_v62, %v3521_v62  ;;  %v2455_v3 = vpop.f32.mrb[5].mxu1 }
 0x28d   : > { %v1165_v4 = vadd.f32 %v1163_v61, %v1161_v60 }
 0x28e   : > { %v1164_v5 = vadd.f32 %v1162_v1, %v1160_v0 }
 0x28f   : > { %v3529_v7 = vmul.f32 0.015625, %v1165_v4 }
 0x290   : > { %v3527_v6 = vmul.f32 0.015625, %v1164_v5 }
 0x292   : > { %2499 = vmatprep.mubr.msk.f32.mxu1 %vm1177_vm3, %v3527_v6 }
 0x293   : > { %2500 = vmatmul.mubr.msk.f32.vlgmr.msra.gmra.mrb[6].mxu1 %vm1177_vm3, %v3529_v7 }
 0x294   : > { %2733 = vmatpush3.bf16.msra.mxu1 %v2723_v50  ;;  %2510 = vmatprep.mubr.msk.f32.mxu1 %vm3120_vm2, %v3121_v56 }
 0x295   : > { %2734 = vmatprep.subr.bf16.mxu1 %v3119_v2 }
 0x298   : > { %2736 = vmatpush3.bf16.msra.mxu1 %v2727_v53 }
 0x299   : > { %2737 = vmatprep.subr.bf16.mxu1 %v3119_v2 }
 0x366   : > { %v2501_v8 = vpop.f32.mrb[6].mxu1 }
 0x367   : > { %v1250_v9 = vpop.f32.mrb[7].mxu1  ;;  %v1268_v12 = vsel %vm1177_vm3, %v2501_v8, 0.0  ;;  %v1262_v13 = vsel %vm1177_vm3, %v2501_v8, -inf }
 0x368   : > { %v1265_v10 = vsel %vm1177_vm3, %v1250_v9, 0.0  ;;  %v1259_v11 = vsel %vm1177_vm3, %v1250_v9, -inf }
 0x369   : > { %1266 = vadd.xlane.f32.xlu1 %v1265_v10  ;;  %1260 = vmax.xlane.f32.xlu0 %v1259_v11 }
 0x36d   : > { %1269 = vadd.xlane.f32.xlu1 %v1268_v12 }
 0x371   : > { %1263 = vmax.xlane.f32.xlu1 %v1262_v13 }
 0x3f6   : > { %v1267_v14 = vpop.xlane.xlu1 %1266  ;;  %v1261_v17 = vpop.xlane.xlu0 %1260 }
 0x3f7   : > { %2894 = vrcp.f32 %v1267_v14 }
 0x3fa   : > { %v1270_v15 = vpop.xlane.xlu1 %1269 }
 0x3fb   : > { %2896 = vrcp.f32 %v1270_v15 }
 0x3fe   : > { %v1264_v20 = vpop.xlane.xlu1 %1263 }
 0x401   : > { %v2895_v16 = vpop.eup %2894 }
 0x402   : > { %v1272_v18 = vmul.f32 %v2895_v16, %v1261_v17 }
 0x404   : > { %2898 = vlog2.f32 %v1272_v18 }
 0x405   : > { %v2897_v19 = vpop.eup %2896 }
 0x406   : > { %v1274_v21 = vmul.f32 %v2897_v19, %v1264_v20 }
 0x408   : > { %2900 = vlog2.f32 %v1274_v21 }
 0x40e   : > { %v2899_v22 = vpop.eup %2898 }
 0x40f   : > { %v1276_v23 = vmul.f32 0.6931472, %v2899_v22 }
 0x411   : > { %v1279_v24 = vmul.f32 0.4342945, %v1276_v23 }
 0x412   : > { %v2901_v25 = vpop.eup %2900 }
 0x413   : > { %v1281_v26 = vrot.slane %v1279_v24, 4  ;;  %v1278_v27 = vmul.f32 0.6931472, %v2901_v25 }
 0x415   : > { %v1282_v28 = vmax.f32 %v1279_v24, %v1281_v26  ;;  %v1280_v29 = vmul.f32 0.4342945, %v1278_v27 }
 0x417   : > { %v1283_v30 = vrot.slane %v1282_v28, 2  ;;  %v1287_v31 = vrot.slane %v1280_v29, 4 }
 0x419   : > { %v1284_v32 = vmax.f32 %v1282_v28, %v1283_v30  ;;  %v1288_v33 = vmax.f32 %v1280_v29, %v1287_v31 }
 0x41b   : > { %v1285_v34 = vrot.slane %v1284_v32, 1  ;;  %v1289_v35 = vrot.slane %v1288_v33, 2 }
 0x41d   : > { %v1286_v36 = vmax.f32 %v1284_v32, %v1285_v34  ;;  %v1290_v37 = vmax.f32 %v1288_v33, %v1289_v35 }
 0x41f   : > { %v1293_v38 = vsub.f32 %v1279_v24, %v1286_v36  ;;  %v1291_v39 = vrot.slane %v1290_v37, 1 }
 0x421   : > { %v1295_v40 = vmul.f32 1.442695, %v1293_v38  ;;  %v1292_v41 = vmax.f32 %v1290_v37, %v1291_v39 }
 0x423   : > { %2902 = vpow2.f32 %v1295_v40  ;;  %v1294_v42 = vsub.f32 %v1280_v29, %v1292_v41 }
 0x425   : > { %v1297_v43 = vmul.f32 1.442695, %v1294_v42 }
 0x427   : > { %2904 = vpow2.f32 %v1297_v43 }
 0x42d   : > { %v2903_v44 = vpop.eup %2902 }
 0x42e   : > { %v1299_v45 = vrot.slane %v2903_v44, 4 }
 0x430   : > { %v1300_v46 = vadd.f32 %v2903_v44, %v1299_v45 }
 0x431   : > { %v2905_v47 = vpop.eup %2904 }
 0x432   : > { %v1301_v48 = vrot.slane %v1300_v46, 2  ;;  %v1305_v49 = vrot.slane %v2905_v47, 4 }
 0x434   : > { %v1306_v50 = vadd.f32 %v2905_v47, %v1305_v49  ;;  %v1302_v51 = vadd.f32 %v1301_v48, %v1300_v46 }
 0x436   : > { %v1307_v52 = vrot.slane %v1306_v50, 2  ;;  %v1303_v53 = vrot.slane %v1302_v51, 1 }
 0x438   : > { %v1304_v57 = vadd.f32 %v1303_v53, %v1302_v51  ;;  %v1308_v58 = vadd.f32 %v1307_v52, %v1306_v50 }
 0x43a   : > { %v1309_v60 = vrot.slane %v1308_v58, 1  ;;  %2906 = vrcp.f32 %v1304_v57 }
 0x43c   : > { %v1310_v61 = vadd.f32 %v1309_v60, %v1308_v58 }
 0x43e   : > { %2908 = vrcp.f32 %v1310_v61 }
 0x444   : > { %v2907_v63 = vpop.eup %2906 }
 0x445   : > { %v1312_v0 = vmul.f32 %v2907_v63, %v2903_v44 }
 0x447   : > { %v1315_v1 = vmul.f32 %v1312_v0, %v3527_v6  ;;  %v1489_v3 = vmul.f32 %v1312_v0, %v3513_v55  ;;  %v1505_v4 = vmul.f32 %v1312_v0, %v3521_v62 }
 0x448   : > { %v2909_v5 = vpop.eup %2908 }
 0x449   : > { %v1314_v8 = vmul.f32 %v2909_v5, %v2905_v47  ;;  %v1317_v9 = vsel %vm1177_vm3, %v1315_v1, 0.0  ;;  %v1491_v10 = vsel %vm1177_vm3, %v1489_v3, 0.0  ;;  %v1507_v11 = vsel %vm1177_vm3, %v1505_v4, 0.0 }
 0x44a   : > { %v1318_v12 = vrot.slane %v1317_v9, 4  ;;  %v1492_v13 = vrot.slane %v1491_v10, 4  ;;  %v1508_v14 = vrot.slane %v1507_v11, 4  ;;  %v1173_v4 = vlaneseq }
 0x44b   : > { %v1316_v15 = vmul.f32 %v1314_v8, %v3529_v7  ;;  %v1490_v16 = vmul.f32 %v1314_v8, %v3511_v54  ;;  %v1506_v17 = vmul.f32 %v1314_v8, %v3515_v59  ;;  %v3122_v8 = vmov 1966171168  }
 0x44c   : > { %v1319_v55 = vadd.f32 %v1318_v12, %v1317_v9  ;;  %v1493_v18 = vadd.f32 %v1492_v13, %v1491_v10  ;;  %v1509_v62 = vadd.f32 %v1508_v14, %v1507_v11  ;;  %v3563_v5 = vshrl.u32 %v1173_v4, 7 }
 0x44d   : > { %v1324_v19 = vsel %vm1177_vm3, %v1316_v15, 0.0  ;;  %v1498_v20 = vsel %vm1177_vm3, %v1490_v16, 0.0  ;;  %v1514_v21 = vsel %vm1177_vm3, %v1506_v17, 0.0  ;;  %v1558_v9 = vunpack.c.l.s4 %v3122_v8 }
 0x44e   : > { %v1320_v22 = vrot.slane %v1319_v55, 2  ;;  %v1325_v23 = vrot.slane %v1324_v19, 4  ;;  %v1494_v24 = vrot.slane %v1493_v18, 2  ;;  %v1499_v25 = vrot.slane %v1498_v20, 4 }
 0x44f   : > { %v1510_v26 = vrot.slane %v1509_v62, 2  ;;  %v1515_v27 = vrot.slane %v1514_v21, 4  ;;  %vm1175_vm6 = vcmp.eq.s32.totalorder %v3563_v5, 0  ;;  %v1559_v10 = vunpack.c.0.s8 %v1558_v9 }
 0x450   : > { %v1321_v28 = vadd.f32 %v1320_v22, %v1319_v55  ;;  %v1326_v29 = vadd.f32 %v1325_v23, %v1324_v19  ;;  %v1495_v54 = vadd.f32 %v1494_v24, %v1493_v18  ;;  %v1500_v30 = vadd.f32 %v1499_v25, %v1498_v20 }
 0x451   : > { %v1511_v59 = vadd.f32 %v1510_v26, %v1509_v62  ;;  %v1516_v31 = vadd.f32 %v1515_v27, %v1514_v21  ;;  %v3123_v11 = vmov 0.0625   ;;  %v1562_v14 = vsub.s32 %v1559_v10, %v3563_v5 }
 0x452   : > { %v1327_v32 = vrot.slane %v1326_v29, 2  ;;  %v1496_v33 = vrot.slane %v1495_v54, 1  ;;  %v1501_v34 = vrot.slane %v1500_v30, 2  ;;  %v1322_v37 = vrot.slane %v1321_v28, 1 }
 0x453   : > { %v1512_v35 = vrot.slane %v1511_v59, 1  ;;  %v1517_v36 = vrot.slane %v1516_v31, 2  ;;  %v1176_v12 = vsel %vm1175_vm6, 0.03125, %v3123_v11  ;;  %v1581_v62 = vsub.s32 0, %v3563_v5 }
 0x454   : > { %v1328_v38 = vadd.f32 %v1327_v32, %v1326_v29  ;;  %v1497_v39 = vadd.f32 %v1496_v33, %v1495_v54  ;;  %v1502_v40 = vadd.f32 %v1501_v34, %v1500_v30  ;;  %v1323_v48 = vadd.f32 %v1322_v37, %v1321_v28  ;;  %v3578_v28 = vld [vmem:[%s3695_s5] sm:$0x3] }
 0x455   : > { %v1513_v41 = vadd.f32 %v1512_v35, %v1511_v59  ;;  %v1518_v42 = vadd.f32 %v1517_v36, %v1516_v31  ;;  %v1543_v29 = vrot.slane %v3578_v28, 1  ;;  %v1601_v37 = vrot.slane %v1176_v12, %v1581_v62 }
 0x456   : > { %v1329_v43 = vrot.slane %v1328_v38, 1  ;;  %v1503_v44 = vrot.slane %v1502_v40, 1  ;;  %v1521_v45 = vmul.f32 %v1497_v39, %v1497_v39  ;;  %v1616_v8 = vand.u32 127, %v1173_v4  ;;  %v1750_v4 = vld [vmem:[#allocation8 + $0x58] sm:$0xff] }
 0x457   : > { %v1519_v46 = vrot.slane %v1518_v42, 1  ;;  %v1523_v47 = vmul.f32 %v1513_v41, %v1513_v41  ;;  %vm2024_vm6 = vcmask 221240  }
 0x458   : > { %v1330_v49 = vadd.f32 %v1329_v43, %v1328_v38  ;;  %v1504_v50 = vadd.f32 %v1503_v44, %v1502_v40  ;;  %v1604_v38 = vsub.s32 1, %v3563_v5  ;;  %v2203_v43 = vld [vmem:[%s704_s19] ss:$0 sm:$0xff]  ;;  %v1626_v11 = vadd.s32 4294967287, %v1616_v8 }
 0x459   : > { %v1520_v51 = vadd.f32 %v1519_v46, %v1518_v42  ;;  %v1525_v52 = vadd.f32 %v1523_v47, %v1521_v45  ;;  %v1656_v45 = vld [vmem:[%s3700_s10] sm:$0xff]  ;;  %v1657_v46 = vld [vmem:[%s3700_s10 + $0x8] sm:$0xff] }
 0x45a   : > { %v1334_v53 = vsel %vm1333_vm4, %v1330_v49, %v1323_v48  ;;  %v1522_v57 = vmul.f32 %v1504_v50, %v1504_v50  ;;  %v1605_v41 = vrot.slane %v1176_v12, %v1604_v38  ;;  %v2738_v47 = vpack.c.bf16 %v1657_v46, %v1656_v45  ;;  %v1658_v48 = vld [vmem:[%s3700_s10 + $0x10] sm:$0x1f] }
 0x45b   : > { %2511 = vmatmul.mubr.msk.f32.vlgmr.msra.gmra.mrb[8].mxu1 %vm1177_vm3, %v1334_v53  ;;  %v1524_v58 = vmul.f32 %v1520_v51, %v1520_v51  ;;  %v1414_v49 = vsel %vm1177_vm3, %v3527_v6, 0.0  ;;  %v1417_v50 = vsel %vm1177_vm3, %v3529_v7, 0.0  ;;  %v1739_v51 = vld [vmem:[#allocation8] sm:$0xff]  ;;  %v1741_v53 = vld [vmem:[#allocation8 + $0x10] sm:$0xff] }
 0x45c   : > { %2519 = vmatprep.mubr.msk.f32.mxu1 %vm3120_vm2, %v3121_v56  ;;  %2739 = vmatpush3.bf16.msra.mxu1 %v2738_v47 }
 0x45d   : > { %v1526_v60 = vadd.f32 %v1524_v58, %v1522_v57  ;;  %2517 = vmatprep.subr.mxu1 %v3121_v56  ;;  %v1742_v58 = vld [vmem:[#allocation8 + $0x18] sm:$0xff] }
 0x45f   : > { %v1529_v1 = vsel %vm1333_vm4, %v1526_v60, %v1525_v52 }
 0x460   : > { %v1531_v3 = vsel %vm1407_vm5, %v1529_v1, 0.0  ;;  %2518 = vmatpush3.msk.msra.mxu1 %vm1664_vm8, %v1658_v48  ;;  %v1745_v1 = vld [vmem:[#allocation8 + $0x30] sm:$0xff] }
 0x461   : > { %2764 = vmatprep.subr.bf16.mxu1 %v3119_v2 }
 0x52e   : > { %v1403_v61 = vpop.f32.mrb[8].mxu1 }
 0x52f   : > { %v2512_v63 = vpop.f32.mrb[9].mxu1  ;;  %v1408_v0 = vsel %vm1407_vm5, %v1403_v61, 0.0 }
 0x530   : > { %1409 = vadd.xlane.f32.xlu1 %v1408_v0  ;;  %v1744_v63 = vld [vmem:[#allocation8 + $0x28] sm:$0xff] }
 0x534   : > { %1532 = vadd.xlane.f32.xlu1 %v1531_v3  ;;  %v1746_v3 = vld [vmem:[#allocation8 + $0x38] sm:$0xff] }
 0x535   : > { %v2750_v10 = vpack.c.bf16 %v1746_v3, %v1745_v1 }
 0x5bd   : > { %v1410_v13 = vpop.xlane.xlu1 %1409 }
 0x5be   : > { %v1411_v15 = vmul.f32 %v1410_v13, %v1176_v12  ;;  %v1747_v12 = vld [vmem:[#allocation8 + $0x40] sm:$0xff]  ;;  %v1748_v13 = vld [vmem:[#allocation8 + $0x48] sm:$0xff] }
 0x5c0   : > { %vm1412_vm7 = vcmp.gt.f32.partialorder %v1403_v61, %v1411_v15  ;;  %v1743_v61 = vld [vmem:[#allocation8 + $0x20] sm:$0xff] }
 0x5c1   : > { %v3568_v16 = vsel %vm1412_vm7, 1.0, %v3121_v56  ;;  %v1533_v17 = vpop.xlane.xlu1 %1532  ;;  %v2747_v0 = vpack.c.bf16 %v1744_v63, %v1743_v61  ;;  %vm2026_vm7 = vcmask 1040608  }
 0x5c2   : > { %v1563_v55 = vrot.slane %v3568_v16, %v1562_v14  ;;  %v1535_v18 = vrot.slane %v1533_v17, 1  ;;  %2910 = vrcp.f32 %v1533_v17  ;;  %v2753_v17 = vpack.c.bf16 %v1748_v13, %v1747_v12 }
 0x5c3   : > { %v1424_v3 = vmul.f32 %v3568_v16, %v3578_v28 }
 0x5c4   : > { %v1564_v19 = vcombine.high %v1563_v55, %v1563_v55  ;;  %2912 = vrcp.f32 %v1535_v18  ;;  %v1571_v20 = vrot.slane %v1563_v55, %v1562_v14  ;;  %v1629_v55 = vsub.s32 %v1626_v11, %v3563_v5  ;;  %v1749_v18 = vld [vmem:[#allocation8 + $0x50] sm:$0xff] }
 0x5c6   : > { %v1582_v21 = vrot.slane %v1571_v20, %v1581_v62  ;;  %v1578_v22 = vrot.slane %v1564_v19, %v1562_v14  ;;  %v1619_v14 = vsub.s32 %v1616_v8, %v3563_v5  ;;  %v2756_v20 = vpack.c.bf16 %v1750_v4, %v1749_v18 }
 0x5c8   : > { %v1589_v23 = vmul.f32 %v1582_v21, %v3527_v6  ;;  %v1586_v24 = vrot.slane %v1578_v22, %v1581_v62  ;;  %v1751_v22 = vld [vmem:[#allocation8 + $0x60] sm:$0xff] }
 0x5ca   : > { %v1591_v25 = vsel %vm1177_vm3, %v1589_v23, 0.0  ;;  %v1590_v26 = vmul.f32 %v1586_v24, %v3529_v7  ;;  %v1752_v23 = vld [vmem:[#allocation8 + $0x68] sm:$0xff] }
 0x5cb   : > { %1592 = vadd.xlane.f32.xlu1 %v1591_v25 }
 0x5cc   : > { %v2911_v27 = vpop.eup %2910  ;;  %v1594_v30 = vsel %vm1177_vm3, %v1590_v26, 0.0  ;;  %vm2008_vm3 = vcmask 25625  }
 0x5cd   : > { %v1539_v59 = vmul.f32 %v2911_v27, %v1525_v52  ;;  %v1740_v52 = vld [vmem:[#allocation8 + $0x8] sm:$0xff] }
 0x5ce   : > { %v2913_v54 = vpop.eup %2912  ;;  %v2741_v57 = vpack.c.bf16 %v1740_v52, %v1739_v51  ;;  %v1651_v27 = vld [vmem:[%s3698_s8] sm:$0x1] }
 0x5cf   : > { %1595 = vadd.xlane.f32.xlu1 %v1594_v30  ;;  %v1541_v31 = vmul.f32 %v2913_v54, %v1526_v60  ;;  %v1546_v33 = vmul.f32 %v1539_v59, %v3578_v28  ;;  %v2744_v60 = vpack.c.bf16 %v1742_v58, %v1741_v53  ;;  %v2759_v54 = vpack.c.bf16 %v1752_v23, %v1751_v22  ;;  %v1653_v30 = vld [vmem:[%s3699_s9] sm:$0x1] }
 0x5d0   : > { %2742 = vmatpush3.bf16.msra.mxu0 %v2741_v57 }
 0x5d1   : > { %v1547_v32 = vmul.f32 %v1543_v29, %v1541_v31  ;;  %2743 = vmatprep.subr.bf16.mxu0 %v3119_v2 }
 0x5d3   : > { %v1550_v34 = vrot.slane %v1547_v32, 7 }
 0x5d4   : > { %2745 = vmatpush3.bf16.msra.mxu0 %v2744_v60 }
 0x5d5   : > { %v1551_v35 = vsel %vm1333_vm4, %v1550_v34, %v1546_v33  ;;  %2746 = vmatprep.subr.bf16.mxu0 %v3119_v2 }
 0x5d6   : > { %v1553_v36 = vsel %vm1407_vm5, %v1551_v35, 0.0 }
 0x5d7   : > { %1554 = vadd.xlane.f32.xlu1 %v1553_v36 }
 0x5d8   : > { %2748 = vmatpush3.bf16.msra.mxu0 %v2747_v0 }
 0x5d9   : > { %2749 = vmatprep.subr.bf16.mxu0 %v3119_v2 }
 0x5dc   : > { %2751 = vmatpush3.bf16.msra.mxu0 %v2750_v10 }
 0x5dd   : > { %2752 = vmatprep.subr.bf16.mxu0 %v3119_v2 }
 0x5e0   : > { %2754 = vmatpush3.bf16.msra.mxu0 %v2753_v17 }
 0x5e1   : > { %2755 = vmatprep.subr.bf16.mxu0 %v3119_v2 }
 0x5e4   : > { %2757 = vmatpush3.bf16.msra.mxu0 %v2756_v20 }
 0x5e5   : > { %2758 = vmatprep.subr.bf16.mxu0 %v3119_v2 }
 0x5e8   : > { %2760 = vmatpush3.bf16.msra.mxu0 %v2759_v54  ;;  %v1827_v54 = vld [vmem:[#allocation10] sm:$0xff] }
 0x5e9   : > { %2761 = vmatprep.subr.bf16.mxu0 %v3119_v2 }
 0x658   : > { %v1593_v39 = vpop.xlane.xlu1 %1592 }
 0x659   : > { %v1608_v40 = vmul.f32 %v1601_v37, %v1593_v39 }
 0x65b   : > { %1613 = vperm.xlu1 %2893, %v1608_v40  }
 0x65c   : > { %v1596_v42 = vpop.xlane.xlu1 %1595 }
 0x65d   : > { %v1609_v44 = vmul.f32 %v1605_v41, %v1596_v42 }
 0x65f   : > { %1640 = vrot.lane.b32.xlu1 %v2203_v43, %s3124_s25  ;;  %1624 = vperm.xlu0 %2892, %v1609_v44   ;;  %s3743_s25 = sld [smem:[#allocation25_spill]] }
 0x664   : > { %v3608_v9 = vpop.xlane.xlu1 %1554 }
 0x665   : > { %v1633_v24 = vrot.slane %v3608_v9, 1  ;;  %s3658_s26 = scalar_lea.vmem %s3743_s25, %s3748_s21 }
 0x67e   : > { %1415 = vadd.xlane.f32.xlu0 %v1414_v49 }
 0x683   : > { %1418 = vadd.xlane.f32.xlu1 %v1417_v50 }
 0x6da   : > { %v1614_v15 = vpop.permute.xlu1 %1613 }
 0x6db   : > { %v1620_v62 = vrot.slane %v1614_v15, %v1619_v14 }
 0x6dd   : > { %v1644_v5 = vsel %vm1643_vm9, %v1620_v62, %v3608_v9 }
 0x6de   : > { %v1625_v19 = vpop.permute.xlu0 %1624  ;;  %v1641_v25 = vpop.permute.xlu1 %1640 }
 0x6df   : > { %v1630_v21 = vrot.slane %v1625_v19, %v1629_v55  ;;  %v1444_v55 = vrot.slane %v1424_v3, 1 }
 0x6e1   : > { %v1646_v26 = vsel %vm1645_vm10, %v1644_v5, %v1630_v21 }
 0x6e2   : > { %v1648_v29 = vsel %vm1647_vm11, %v1646_v26, %v1633_v24  ;;  %v1753_v26 = vld [vmem:[#allocation8 + $0x70] sm:$0xff] }
 0x6e3   : > { %v3623_v59 = vsel %vm1649_vm12, %v1648_v29, %v1641_v25 }
 0x6e4   : > { %v1652_v31 = vmul.f32 %v1651_v27, %v3623_v59  ;;  %v1754_v27 = vld [vmem:[#allocation8 + $0x78] sm:$0xff] }
 0x6e5   : > { %v2762_v29 = vpack.c.bf16 %v1754_v27, %v1753_v26  ;;  %v1843_v27 = vld [vmem:[%s3745_s15] sm:$0x1] }
 0x6e6   : > { %v1654_v32 = vadd.f32 %v1653_v30, %v1652_v31  ;;  %v1828_v30 = vld [vmem:[#allocation10 + $0x8] sm:$0xff]  ;;  %v1829_v31 = vld [vmem:[#allocation10 + $0x10] sm:$0xff] }
 0x6e7   : > { %2763 = vmatpush3.bf16.msra.mxu0 %v2762_v29 }
 0x6e8   : > { %v1655_v33 = vmax.f32 %v1654_v32, 0.0  ;;  %2788 = vmatprep.subr.bf16.mxu0 %v3119_v2  ;;  %v2765_v32 = vpack.c.bf16 %v1828_v30, %v1827_v54 }
 0x6ea   : > { %2520 = vmatmul.mubr.msk.f32.vlgmr.msra.gmra.mrb[10].mxu1 %vm1660_vm13, %v1655_v33  ;;  %v1830_v33 = vld [vmem:[#allocation10 + $0x18] sm:$0xff] }
 0x6eb   : > { %2589 = vmatprep.mubr.msk.f32.mxu1 %vm3120_vm2, %v3121_v56  ;;  %2766 = vmatpush3.bf16.msra.mxu1 %v2765_v32 }
 0x6ec   : > { %2767 = vmatprep.subr.bf16.mxu1 %v3119_v2 }
 0x70b   : > { %v1416_v34 = vpop.xlane.xlu0 %1415 }
 0x70c   : > { %2914 = vrcp.f32 %v1416_v34  ;;  %v2768_v34 = vpack.c.bf16 %v1830_v33, %v1829_v31  ;;  %v1931_v31 = vld [vmem:[#allocation2] sm:$0x1] }
 0x70e   : > { %2769 = vmatpush3.bf16.msra.mxu1 %v2768_v34 }
 0x70f   : > { %2770 = vmatprep.subr.bf16.mxu1 %v3119_v2 }
 0x710   : > { %v1419_v35 = vpop.xlane.xlu1 %1418 }
 0x711   : > { %2916 = vrcp.f32 %v1419_v35  ;;  %v1831_v35 = vld [vmem:[#allocation10 + $0x20] sm:$0xff] }
 0x716   : > { %v2915_v36 = vpop.eup %2914 }
 0x717   : > { %v1421_v37 = vmul.f32 %v2915_v36, %v3527_v6  ;;  %v1832_v36 = vld [vmem:[#allocation10 + $0x28] sm:$0xff] }
 0x719   : > { %v1459_v38 = vrot.slane %v1421_v37, 4  ;;  %v1426_v39 = vsel %vm1425_vm14, %v1421_v37, 0.0  ;;  %v2771_v37 = vpack.c.bf16 %v1832_v36, %v1831_v35 }
 0x71a   : > { %v1427_v40 = vrot.slane %v1426_v39, 4 }
 0x71b   : > { %v2917_v41 = vpop.eup %2916  ;;  %v1463_v42 = vsel %vm1425_vm14, %v1459_v38, 0.0  ;;  %v1833_v38 = vld [vmem:[#allocation10 + $0x30] sm:$0xff]  ;;  %2772 = vmatpush3.bf16.msra.mxu1 %v2771_v37 }
 0x71c   : > { %v1423_v43 = vmul.f32 %v2917_v41, %v3529_v7  ;;  %v1428_v44 = vadd.f32 %v1427_v40, %v1426_v39  ;;  %v1464_v45 = vrot.slane %v1463_v42, 4  ;;  %v1834_v39 = vld [vmem:[#allocation10 + $0x38] sm:$0xff]  ;;  %2773 = vmatprep.subr.bf16.mxu1 %v3119_v2  ;;  %v1835_v41 = vld [vmem:[#allocation10 + $0x40] sm:$0xff] }
 0x71d   : > { %v2774_v40 = vpack.c.bf16 %v1834_v39, %v1833_v38 }
 0x71e   : > { %v1433_v46 = vsel %vm1425_vm14, %v1423_v43, 0.0  ;;  %v1460_v47 = vrot.slane %v1423_v43, 4  ;;  %v1429_v48 = vrot.slane %v1428_v44, 2  ;;  %v1465_v49 = vadd.f32 %v1464_v45, %v1463_v42  ;;  %v1836_v42 = vld [vmem:[#allocation10 + $0x48] sm:$0xff]  ;;  %v1838_v45 = vld [vmem:[#allocation10 + $0x58] sm:$0xff] }
 0x71f   : > { %v1434_v50 = vrot.slane %v1433_v46, 4  ;;  %2775 = vmatpush3.bf16.msra.mxu1 %v2774_v40  ;;  %v2777_v43 = vpack.c.bf16 %v1836_v42, %v1835_v41 }
 0x720   : > { %v1430_v51 = vadd.f32 %v1429_v48, %v1428_v44  ;;  %v1466_v52 = vrot.slane %v1465_v49, 2  ;;  %v1470_v6 = vsel %vm1425_vm14, %v1460_v47, 0.0  ;;  %2776 = vmatprep.subr.bf16.mxu1 %v3119_v2  ;;  %v1837_v44 = vld [vmem:[#allocation10 + $0x50] sm:$0xff]  ;;  %v1840_v47 = vld [vmem:[#allocation10 + $0x68] sm:$0xff] }
 0x721   : > { %v1435_v53 = vadd.f32 %v1434_v50, %v1433_v46  ;;  %v1471_v57 = vrot.slane %v1470_v6, 4  ;;  %v1839_v46 = vld [vmem:[#allocation10 + $0x60] sm:$0xff] }
 0x722   : > { %v1467_v58 = vadd.f32 %v1466_v52, %v1465_v49  ;;  %v1431_v60 = vrot.slane %v1430_v51, 1  ;;  %v2783_v48 = vpack.c.bf16 %v1840_v47, %v1839_v46  ;;  %v1659_v49 = vld [vmem:[%s3742_s0] sm:$0x1] }
 0x723   : > { %v1436_v61 = vrot.slane %v1435_v53, 2  ;;  %v1472_v63 = vadd.f32 %v1471_v57, %v1470_v6  ;;  %2778 = vmatpush3.bf16.msra.mxu1 %v2777_v43 }
 0x724   : > { %v1468_v7 = vrot.slane %v1467_v58, 1  ;;  %v1432_v8 = vadd.f32 %v1431_v60, %v1430_v51  ;;  %2779 = vmatprep.subr.bf16.mxu1 %v3119_v2  ;;  %v1842_v60 = vld [vmem:[#allocation10 + $0x78] sm:$0xff] }
 0x725   : > { %v1437_v0 = vadd.f32 %v1436_v61, %v1435_v53  ;;  %v1473_v1 = vrot.slane %v1472_v63, 2 }
 0x726   : > { %v1469_v13 = vadd.f32 %v1468_v7, %v1467_v58  ;;  %v1441_v15 = vmul.f32 0.25, %v1432_v8  ;;  %v1841_v58 = vld [vmem:[#allocation10 + $0x70] sm:$0xff] }
 0x727   : > { %v1438_v10 = vrot.slane %v1437_v0, 1  ;;  %v1474_v11 = vadd.f32 %v1473_v1, %v1472_v63  ;;  %v2786_v61 = vpack.c.bf16 %v1842_v60, %v1841_v58  ;;  %v1915_v63 = vld [vmem:[#allocation11] sm:$0xff]  ;;  %v1917_v7 = vld [vmem:[#allocation11 + $0x10] sm:$0xff] }
 0x728   : > { %v1477_v62 = vmul.f32 0.25, %v1469_v13  ;;  %v1447_v20 = vmul.f32 %v1441_v15, %v1424_v3  ;;  %v1922_v13 = vld [vmem:[#allocation11 + $0x38] sm:$0xff]  ;;  %v1923_v15 = vld [vmem:[#allocation11 + $0x40] sm:$0xff] }
 0x729   : > { %v1439_v12 = vadd.f32 %v1438_v10, %v1437_v0  ;;  %v1475_v14 = vrot.slane %v1474_v11, 1  ;;  %v1916_v0 = vld [vmem:[#allocation11 + $0x8] sm:$0xff]  ;;  %v1919_v10 = vld [vmem:[#allocation11 + $0x20] sm:$0xff] }
 0x72a   : > { %v1479_v24 = vmul.f32 %v1477_v62, %v1424_v3  ;;  %v2789_v1 = vpack.c.bf16 %v1916_v0, %v1915_v63  ;;  %v1918_v3 = vld [vmem:[#allocation11 + $0x18] sm:$0xff] }
 0x72b   : > { %v1442_v17 = vmul.f32 0.25, %v1439_v12  ;;  %v1476_v18 = vadd.f32 %v1475_v14, %v1474_v11  ;;  %v2792_v8 = vpack.c.bf16 %v1918_v3, %v1917_v7  ;;  %v1920_v11 = vld [vmem:[#allocation11 + $0x28] sm:$0xff] }
 0x72c   : > { %v2795_v12 = vpack.c.bf16 %v1920_v11, %v1919_v10 }
 0x72d   : > { %v1448_v4 = vmul.f32 %v1444_v55, %v1442_v17  ;;  %v1478_v19 = vmul.f32 0.25, %v1476_v18  ;;  %v1924_v17 = vld [vmem:[#allocation11 + $0x48] sm:$0xff]  ;;  %v1925_v18 = vld [vmem:[#allocation11 + $0x50] sm:$0xff] }
 0x72f   : > { %v1451_v21 = vrot.slane %v1448_v4, 7  ;;  %v1480_v22 = vmul.f32 %v1478_v19, %v1444_v55  ;;  %v2801_v55 = vpack.c.bf16 %v1924_v17, %v1923_v15  ;;  %v1926_v4 = vld [vmem:[#allocation11 + $0x58] sm:$0xff]  ;;  %v1927_v19 = vld [vmem:[#allocation11 + $0x60] sm:$0xff] }
 0x730   : > { %v2804_v62 = vpack.c.bf16 %v1926_v4, %v1925_v18 }
 0x731   : > { %v1452_v23 = vsel %vm1333_vm4, %v1451_v21, %v1447_v20  ;;  %v1483_v16 = vrot.slane %v1480_v22, 7  ;;  %v1928_v20 = vld [vmem:[#allocation11 + $0x68] sm:$0xff] }
 0x732   : > { %v1454_v28 = vsel %vm1407_vm5, %v1452_v23, 0.0  ;;  %v2807_v21 = vpack.c.bf16 %v1928_v20, %v1927_v19  ;;  %v1755_v22 = vld [vmem:[%s3744_s22] sm:$0x1] }
 0x733   : > { %1455 = vadd.xlane.f32.xlu1 %v1454_v28  ;;  %v1484_v5 = vsel %vm1333_vm4, %v1483_v16, %v1479_v24  ;;  %vm2010_vm4 = vcmask 33825  }
 0x734   : > { %v1486_v25 = vsel %vm1407_vm5, %v1484_v5, 0.0  ;;  %vm2012_vm5 = vcmask 42025   ;;  %v1929_v5 = vld [vmem:[#allocation11 + $0x70] sm:$0xff] }
 0x735   : > { %1487 = vadd.xlane.f32.xlu0 %v1486_v25  ;;  %v1930_v25 = vld [vmem:[#allocation11 + $0x78] sm:$0xff] }
 0x736   : > { %v2810_v26 = vpack.c.bf16 %v1930_v25, %v1929_v5 }
 0x74b   : > { %2021 = vrot.lane.b32.xlu0 %v3623_v59, %s3125_s29  ;;  %v2780_v59 = vpack.c.bf16 %v1838_v45, %v1837_v44 }
 0x74d   : > { %2781 = vmatpush3.bf16.msra.mxu1 %v2780_v59 }
 0x74e   : > { %2782 = vmatprep.subr.bf16.mxu1 %v3119_v2 }
 0x751   : > { %2784 = vmatpush3.bf16.msra.mxu1 %v2783_v48 }
 0x752   : > { %2785 = vmatprep.subr.bf16.mxu1 %v3119_v2 }
 0x755   : > { %2787 = vmatpush3.bf16.msra.mxu1 %v2786_v61 }
 0x7bd   : > { %v1734_v50 = vpop.f32.mrb[10].mxu1 }
 0x7be   : > { %v1735_v51 = vadd.f32 %v1734_v50, %v1659_v49  ;;  %v2521_v52 = vpop.f32.mrb[11].mxu1 }
 0x7c0   : > { %v1738_v6 = vmax.f32 %v1735_v51, 0.0  ;;  %v1456_v53 = vpop.xlane.xlu1 %1455 }
 0x7c1   : > { %2003 = vst.msk [vmem:[%s3658_s26] sm:$0x1] %vm2002_vm15, %v1456_v53 }
 0x7c2   : > { %v1488_v57 = vpop.xlane.xlu0 %1487  ;;  %2555 = vmatmul.mubr.f32.vlgmr.msra.gmra.mrb[4].mxu0 %v1738_v6 }
 0x7c3   : > { %2005 = vst.msk [vmem:[%s3658_s26] sm:$0x1] %vm2004_vm0, %v1488_v57  ;;  %2624 = vmatprep.mubr.msk.f32.mxu0 %vm3120_vm2, %v3121_v56  ;;  %2790 = vmatpush3.bf16.msra.mxu0 %v2789_v1  ;;  %vm2018_vm2 = vcmask 49200  }
 0x7c4   : > { %2007 = vst.msk [vmem:[%s3658_s26] sm:$0x1] %vm2006_vm1, %v3608_v9  ;;  %2791 = vmatprep.subr.bf16.mxu0 %v3119_v2 }
 0x7c5   : > { %2009 = vst.msk [vmem:[%s3658_s26 - $0x1] sm:$0x2] %vm2008_vm3, %v1456_v53 }
 0x7c6   : > { %2011 = vst.msk [vmem:[%s3658_s26 - $0x1] sm:$0x2] %vm2010_vm4, %v1488_v57  ;;  %v2022_v36 = vpop.permute.xlu0 %2021 }
 0x7c7   : > { %2013 = vst.msk [vmem:[%s3658_s26 - $0x1] sm:$0x2] %vm2012_vm5, %v3608_v9  ;;  %2793 = vmatpush3.bf16.msra.mxu0 %v2792_v8  ;;  %v1921_v9 = vld [vmem:[#allocation11 + $0x30] sm:$0xff] }
 0x7c8   : > { %2794 = vmatprep.subr.bf16.mxu0 %v3119_v2  ;;  %v2798_v14 = vpack.c.bf16 %v1922_v13, %v1921_v9 }
 0x7cb   : > { %2796 = vmatpush3.bf16.msra.mxu0 %v2795_v12 }
 0x7cc   : > { %2797 = vmatprep.subr.bf16.mxu0 %v3119_v2 }
 0x7cf   : > { %2799 = vmatpush3.bf16.msra.mxu0 %v2798_v14 }
 0x7d0   : > { %2800 = vmatprep.subr.bf16.mxu0 %v3119_v2 }
 0x7d3   : > { %2802 = vmatpush3.bf16.msra.mxu0 %v2801_v55 }
 0x7d4   : > { %2803 = vmatprep.subr.bf16.mxu0 %v3119_v2 }
 0x7d7   : > { %2805 = vmatpush3.bf16.msra.mxu0 %v2804_v62 }
 0x7d8   : > { %2806 = vmatprep.subr.bf16.mxu0 %v3119_v2 }
 0x7db   : > { %2808 = vmatpush3.bf16.msra.mxu0 %v2807_v21 }
 0x7dc   : > { %2809 = vmatprep.subr.bf16.mxu0 %v3119_v2 }
 0x7df   : > { %2811 = vmatpush3.bf16.msra.mxu0 %v2810_v26 }
 0x895   : > { %v1822_v23 = vpop.f32.mrb[4].mxu0 }
 0x896   : > { %v1823_v24 = vadd.f32 %v1822_v23, %v1755_v22  ;;  %v2556_v16 = vpop.f32.mrb[5].mxu0 }
 0x898   : > { %v1826_v28 = vmax.f32 %v1823_v24, 0.0 }
 0x89a   : > { %2590 = vmatmul.mubr.f32.vlgmr.msra.gmra.mrb[12].mxu1 %v1826_v28 }
 0x96d   : > { %v1910_v29 = vpop.f32.mrb[12].mxu1 }
 0x96e   : > { %v1911_v2 = vadd.f32 %v1910_v29, %v1843_v27  ;;  %v2591_v54 = vpop.f32.mrb[13].mxu1 }
 0x970   : > { %v1914_v30 = vmax.f32 %v1911_v2, 0.0 }
 0x972   : > { %2625 = vmatmul.mubr.f32.vlgmr.msra.gmra.mrb[6].mxu0 %v1914_v30 }
 0xa45   : > { %v1998_v32 = vpop.f32.mrb[6].mxu0 }
 0xa46   : > { %v1999_v33 = vadd.f32 %v1998_v32, %v1931_v31  ;;  %v2626_v34 = vpop.f32.mrb[7].mxu0 }
 0xa48   : > { %2015 = vrot.lane.b32.xlu1 %v1999_v33, %s3126_s27 }
 0xaba   : > { %v2016_v35 = vpop.permute.xlu1 %2015 }
 0xabb   : > { %2019 = vst.msk [vmem:[%s3658_s26] sm:$0x1] %vm2018_vm2, %v2016_v35 }
 0xabc   : > { %2025 = vst.msk [vmem:[%s3658_s26] sm:$0x1] %vm2024_vm6, %v2022_v36 }
 0xabd   : > { %2027 = vst.msk [vmem:[%s3658_s26] sm:$0x1] %vm2026_vm7, %v3121_v56 }
 0xabe PF: > { %s3746_s20 = sld [smem:[#allocation17_spill]] }
 0xac4   : > { %s36_s20 = sadd.s32 1, %s3746_s20  }
 0xac5   : > { %p33_p9 = scmp.ge.s32.totalorder %s36_s20, 4  }
 0xac7   :  { %35 = sbr.rel (!%p33_p9) target bundleno = 13 (0xd), region = 162 }
 0xace   :  { %2061 = vsyncpa [#allocation4], 1 }
 0xacf   :  { %2063 = vsyncpa [#allocation4 + $0x1], 1 }
 0xad0   :  { %2064 = vsyncpa [#allocation6], 1 }
 0xad1   :  { %2065 = vsyncpa [#allocation9], 1 }
 0xad2   :  { %2066 = vsyncpa [#allocation12], 1 }

</bundles_post_ra>
